<compile_context>
chip_gen: v7x
topology: tpu7x:2x2x1
jax: 0.10.0
libtpu: 0.0.40
codegen_flags: <defaults>
</compile_context>

<pallas_src>
import functools

import jax
import jax.numpy as jnp
from jax import lax
from jax.experimental import pallas as pl
from jax.experimental.pallas import tpu as pltpu

EPS = 1e-12  # matches torch.nn.functional.normalize default eps


def _round_up(v, m):
    return ((v + m - 1) // m) * m


def _cdiv(a, b):
    return -(-a // b)


def _tpu_topology():
    """Returns (per-core VMEM bytes, is_multi_tensorcore_chip) with fallback."""
    vmem = 128 * 1024 * 1024
    try:
        vmem = int(pltpu.get_tpu_info().vmem_capacity_bytes)
    except Exception:
        pass
    multi_core = vmem <= 64 * 1024 * 1024  # v7x: 64 MiB per TC, 2 TCs / chip
    return vmem, multi_core


def _pick_batch_tile(B, n_pad, multi_core):
    """Batch-tile size: big M per MXU pass, but keep both v7x TCs busy."""
    max_rows = 512 if multi_core else 2048
    bt = 1 if n_pad > max_rows else max(1, min(B, max_rows // n_pad))
    if multi_core and B > 1:
        bt = min(bt, _cdiv(B, 2))           # at least 2 grid steps
        for cand in range(bt, 0, -1):       # prefer an even grid length
            if _cdiv(B, cand) % 2 == 0:
                bt = cand
                break
    return bt


def _eaa_kernel(x_ref, wqk_ref, bqk_ref, wg_ref, wpf_ref, wf_ref, bout_ref,
                out_ref, *, scale, n_valid):
    bt, n_pad, d_in = x_ref.shape
    dh = wqk_ref.shape[1] // 2
    m = bt * n_pad

    # Flatten the batch tile so the MXU sees M = bt * n_pad rows.
    x = x_ref[...].astype(jnp.bfloat16).reshape(m, d_in)

    # Fused to_query|to_key: a single MXU pass over x (f32 accumulation).
    qk = jnp.dot(x, wqk_ref[...], preferred_element_type=jnp.float32) + bqk_ref[...]
    q = qk[:, :dh]
    k = qk[:, dh:]

    # Row-wise L2 normalization via EUP rsqrt (matches torch's v/max(||v||,eps)).
    q = q * lax.rsqrt(jnp.maximum(jnp.sum(q * q, axis=-1, keepdims=True), EPS * EPS))
    k = k * lax.rsqrt(jnp.maximum(jnp.sum(k * k, axis=-1, keepdims=True), EPS * EPS))

    # query @ w_g (w_g kept as a (1, dh_p) f32 row) -> (M, 1) on VPU/XLU.
    qw = jnp.sum(q * wg_ref[...], axis=-1, keepdims=True)
    A = (qw * scale).reshape(bt, n_pad, 1)

    # Mask padded tokens out of the per-batch token-axis reductions.
    if n_pad != n_valid:
        tok = lax.broadcasted_iota(jnp.int32, (bt, n_pad, 1), 1)
        A = jnp.where(tok < n_valid, A, 0.0)

    # Normalize A over the token axis.
    A = A * lax.rsqrt(jnp.maximum(jnp.sum(A * A, axis=1, keepdims=True), EPS * EPS))

    q3 = q.reshape(bt, n_pad, dh)
    k3 = k.reshape(bt, n_pad, dh)

    # Global query vector per batch element: G_b = sum_n A_bn * q_bn.
    G = jnp.sum(A * q3, axis=1, keepdims=True)                      # (bt, 1, dh)

    # Fused tail: final(Proj(G*k) + q) = (G*k)@Wpf + q@Wf + bout.
    gk = (G * k3).reshape(m, dh).astype(jnp.bfloat16)
    out = jnp.dot(gk, wpf_ref[...], preferred_element_type=jnp.float32)
    out = out + jnp.dot(q.astype(jnp.bfloat16), wf_ref[...],
                        preferred_element_type=jnp.float32)
    out = out + bout_ref[...]

    out_ref[...] = out.reshape(bt, n_pad, out_ref.shape[-1]).astype(out_ref.dtype)


def prepare_params(params, token_dim):
    """One-time padding / fusion / bf16 cast of the module weights.

    Call once and cache the result; do NOT re-run per forward pass.
    """
    wq, bq, wk, bk, wg, wp, bp, wf, bf = params
    D_in, Dh = wq.shape
    d_in_p = _round_up(D_in, 128)
    dh_p = _round_up(Dh, 128)
    td_p = _round_up(token_dim, 128)

    def pad2(a, r, c):
        return jnp.pad(a, ((0, r - a.shape[0]), (0, c - a.shape[1])))

    def pad1(a, n):
        return jnp.pad(a, (0, n - a.shape[0]))

    wqk = jnp.concatenate([pad2(wq, d_in_p, dh_p), pad2(wk, d_in_p, dh_p)],
                          axis=1).astype(jnp.bfloat16)               # (d_in_p, 2*dh_p)
    bqk = jnp.concatenate([pad1(bq, dh_p), pad1(bk, dh_p)]
                          ).reshape(1, 2 * dh_p).astype(jnp.float32)
    wg_row = pad2(wg, dh_p, 1).T.astype(jnp.float32)                 # (1, dh_p)
    # final(Proj(G*k) + q) = (G*k) @ (Wp@Wf) + q @ Wf + (bp@Wf + bf)
    wpf = pad2(wp @ wf, dh_p, td_p).astype(jnp.bfloat16)
    wf_p = pad2(wf, dh_p, td_p).astype(jnp.bfloat16)
    bout = pad1(bp @ wf + bf, td_p).reshape(1, td_p).astype(jnp.float32)
    return (wqk, bqk, wg_row, wpf, wf_p, bout)


def efficient_additive_attention(x, prepared, token_dim):
    """x: [B, N, D_in] -> [B, N, token_dim] (same semantics as the torch module)."""
    wqk_p, bqk_p, wg_p, wpf_p, wf_p, bout_p = prepared
    B, N, D_in = x.shape
    d_in_p = wqk_p.shape[0]
    dh_p = wqk_p.shape[1] // 2
    td_p = wf_p.shape[1]
    out_dtype = x.dtype
    out_itemsize = jnp.dtype(out_dtype).itemsize
    assert d_in_p >= D_in and td_p >= token_dim

    n_pad = _round_up(N, 16)  # bf16 native (16, 128) tile -> layout-free reshapes

    vmem_bytes, multi_core = _tpu_topology()
    vmem_cap = max(16 * 1024 * 1024, vmem_bytes - 16 * 1024 * 1024)  # headroom

    bt = _pick_batch_tile(B, n_pad, multi_core)

    weight_bytes = ((d_in_p * 2 * dh_p + 2 * dh_p * td_p) * 2        # bf16 weights
                    + (3 * dh_p + td_p) * 4)                         # f32 bias/wg rows

    x_needs_pad = (n_pad != N) or (d_in_p != D_in)
    x_itemsize = 2 if x_needs_pad else jnp.dtype(x.dtype).itemsize

    def tile_bytes(bt_):
        rows = bt_ * n_pad
        return (2 * rows * d_in_p * x_itemsize       # x tile (double-buffered)
                + 2 * rows * td_p * out_itemsize     # out tile (double-buffered)
                + 2 * weight_bytes                   # resident weights (<=2 bufs)
                + rows * (5 * dh_p + td_p) * 4)      # f32 intermediates

    while bt > 1 and tile_bytes(bt) > vmem_cap // 2:
        bt = _cdiv(bt, 2)

    grid_b = _cdiv(B, bt)
    b_pad = bt * grid_b

    if x_needs_pad or b_pad != B:
        x_p = jnp.pad(x, ((0, b_pad - B), (0, n_pad - N),
                          (0, d_in_p - D_in))).astype(jnp.bfloat16)
    else:
        x_p = x  # aligned already: skip the wrapper pad/cast, cast in-kernel

    vmem_limit = int(min(vmem_cap, max(2 * tile_bytes(bt), 16 * 1024 * 1024)))

    kernel = functools.partial(_eaa_kernel, scale=token_dim ** (-0.5), n_valid=N)

    flops = int(2 * b_pad * n_pad * (d_in_p * 2 * dh_p + 2 * dh_p * td_p)
                + 12 * b_pad * n_pad * dh_p)
    bytes_accessed = int(x_p.size * x_p.dtype.itemsize
                         + weight_bytes * grid_b
                         + b_pad * n_pad * td_p * out_itemsize)
    cost = pl.CostEstimate(flops=flops,
                           transcendentals=int(3 * b_pad * n_pad),
                           bytes_accessed=bytes_accessed)

    def build_call(single_buffer_weights):
        if single_buffer_weights:
            def wspec(shape):
                # Constant index_map -> never re-fetched; one buffer is enough.
                return pl.BlockSpec(shape, lambda i: (0,) * len(shape),
                                    pipeline_mode=pl.Buffered(1))
        else:
            def wspec(shape):
                return pl.BlockSpec(shape, lambda i: (0,) * len(shape))

        return pl.pallas_call(
            kernel,
            out_shape=jax.ShapeDtypeStruct((b_pad, n_pad, td_p), out_dtype),
            grid_spec=pltpu.PrefetchScalarGridSpec(
                num_scalar_prefetch=0,
                grid=(grid_b,),
                in_specs=[
                    pl.BlockSpec((bt, n_pad, d_in_p), lambda i: (i, 0, 0)),  # x
                    wspec((d_in_p, 2 * dh_p)),                               # Wq|Wk
                    wspec((1, 2 * dh_p)),                                    # bq|bk
                    wspec((1, dh_p)),                                        # w_g row
                    wspec((dh_p, td_p)),                                     # Wp@Wf
                    wspec((dh_p, td_p)),                                     # Wf
                    wspec((1, td_p)),                                        # bp@Wf+bf
                ],
                out_specs=pl.BlockSpec((bt, n_pad, td_p), lambda i: (i, 0, 0)),
            ),
            compiler_params=pltpu.CompilerParams(
                dimension_semantics=("parallel",),
                vmem_limit_bytes=vmem_limit),
            cost_estimate=cost,
        )

    args = (x_p, wqk_p, bqk_p, wg_p, wpf_p, wf_p, bout_p)
    try:
        out_p = build_call(True)(*args)
    except Exception:
        # Fallback for jax versions without per-arg pipeline_mode support.
        out_p = build_call(False)(*args)

    return out_p[:B, :N, :token_dim]


# ----------------------------------------------------------------------------
# Pure-JAX references.


def _reference_f32(x, params, token_dim):
    """Full-f32 mirror of the PyTorch forward."""
    wq, bq, wk, bk, wg, wp, bp, wf, bf = params
    scale = token_dim ** (-0.5)

    def l2norm(v, axis):
        n = jnp.sqrt(jnp.sum(v * v, axis=axis, keepdims=True))
        return v / jnp.maximum(n, EPS)

    q = x @ wq + bq
    k = x @ wk + bk
    q = l2norm(q, -1)
    k = l2norm(k, -1)
    A = l2norm((q @ wg) * scale, 1)                        # [B, N, 1]
    G = jnp.sum(A * q, axis=1, keepdims=True)              # [B, 1, Dh]
    out = (G * k) @ wp + bp + q
    return out @ wf + bf


def _reference_mixed(x, params, token_dim):
    """Mirror of the kernel's math: bf16 MXU matmuls, fused Wp@Wf, f32 norms."""
    wq, bq, wk, bk, wg, wp, bp, wf, bf = params
    bf16, f32 = jnp.bfloat16, jnp.float32
    mm = lambda a, b: jnp.dot(a.astype(bf16), b.astype(bf16),
                              preferred_element_type=f32)
    scale = token_dim ** (-0.5)

    def l2norm(v, axis):
        return v * lax.rsqrt(jnp.maximum(jnp.sum(v * v, axis=axis, keepdims=True),
                                         EPS * EPS))

    q = mm(x, wq) + bq
    k = mm(x, wk) + bk
    q = l2norm(q, -1)
    k = l2norm(k, -1)
    A = l2norm(jnp.sum(q * wg[:, 0], axis=-1, keepdims=True) * scale, 1)
    G = jnp.sum(A * q, axis=1, keepdims=True)
    return mm(G * k, wp @ wf) + mm(q, wf) + (bp @ wf + bf)


def init_params(key, in_dims, token_dim, num_heads):
    Dh = token_dim * num_heads
    ks = jax.random.split(key, 9)
    s_in = 1.0 / jnp.sqrt(in_dims)
    s_dh = 1.0 / jnp.sqrt(Dh)
    wq = jax.random.uniform(ks[0], (in_dims, Dh), jnp.float32, -s_in, s_in)
    bq = jax.random.uniform(ks[1], (Dh,), jnp.float32, -s_in, s_in)
    wk = jax.random.uniform(ks[2], (in_dims, Dh), jnp.float32, -s_in, s_in)
    bk = jax.random.uniform(ks[3], (Dh,), jnp.float32, -s_in, s_in)
    wg = jax.random.normal(ks[4], (Dh, 1), jnp.float32)      # torch.randn(Dh, 1)
    wp = jax.random.uniform(ks[5], (Dh, Dh), jnp.float32, -s_dh, s_dh)
    bp = jax.random.uniform(ks[6], (Dh,), jnp.float32, -s_dh, s_dh)
    wf = jax.random.uniform(ks[7], (Dh, token_dim), jnp.float32, -s_dh, s_dh)
    bf = jax.random.uniform(ks[8], (token_dim,), jnp.float32, -s_dh, s_dh)
    return (wq, bq, wk, bk, wg, wp, bp, wf, bf)


if __name__ == "__main__":
    B, N = 2, 8
    in_dims, token_dim, num_heads = 32, 16, 2

    key = jax.random.PRNGKey(0)
    kx, kp = jax.random.split(key)
    x = jax.random.normal(kx, (B, N, in_dims), jnp.float32)
    params = init_params(kp, in_dims, token_dim, num_heads)

    prepared = prepare_params(params, token_dim)   # one-time weight prep (cache this)

    out = jax.block_until_ready(
        efficient_additive_attention(x, prepared, token_dim))

    ref_mixed = _reference_mixed(x, params, token_dim)
    ref_f32 = _reference_f32(x, params, token_dim)

    assert out.shape == (B, N, token_dim)
    assert jnp.allclose(out, ref_mixed, atol=2e-2, rtol=2e-2), \
        "mismatch vs mixed-precision reference"
    assert jnp.allclose(out, ref_f32, atol=5e-2, rtol=5e-2), \
        "mismatch vs f32 reference"

    print("KERNEL_OK")
</pallas_src>

<mosaic_0001>
module attributes {stable_mosaic.version = 11 : i64} {
  func.func @_eaa_kernel(%arg0: i32, %arg1: memref<2x16x128xbf16, #tpu.memory_space<vmem>>, %arg2: memref<128x256xbf16, #tpu.memory_space<vmem>>, %arg3: memref<1x256xf32, #tpu.memory_space<vmem>>, %arg4: memref<1x128xf32, #tpu.memory_space<vmem>>, %arg5: memref<128x128xbf16, #tpu.memory_space<vmem>>, %arg6: memref<128x128xbf16, #tpu.memory_space<vmem>>, %arg7: memref<1x128xf32, #tpu.memory_space<vmem>>, %arg8: memref<2x16x128xf32, #tpu.memory_space<vmem>>) attributes {dimension_semantics = [#tpu.dimension_semantics<parallel>], iteration_bounds = array<i64: 1>, scalar_prefetch = 0 : i64, scratch_operands = 0 : i64, tpu.core_type = #tpu.core_type<tc>, window_params = [{transform_indices = @transform_0, window_bounds = array<i64: 2, 16, 128>}, {pipeline_mode = #tpu.pipeline_mode<synchronous>, transform_indices = @transform_1, window_bounds = array<i64: 128, 256>}, {pipeline_mode = #tpu.pipeline_mode<synchronous>, transform_indices = @transform_2, window_bounds = array<i64: 1, 256>}, {pipeline_mode = #tpu.pipeline_mode<synchronous>, transform_indices = @transform_3, window_bounds = array<i64: 1, 128>}, {pipeline_mode = #tpu.pipeline_mode<synchronous>, transform_indices = @transform_4, window_bounds = array<i64: 128, 128>}, {pipeline_mode = #tpu.pipeline_mode<synchronous>, transform_indices = @transform_5, window_bounds = array<i64: 128, 128>}, {pipeline_mode = #tpu.pipeline_mode<synchronous>, transform_indices = @transform_6, window_bounds = array<i64: 1, 128>}, {transform_indices = @transform_7, window_bounds = array<i64: 2, 16, 128>}]} {
    %c0 = arith.constant 0 : index
    %c0_0 = arith.constant 0 : index
    %c0_1 = arith.constant 0 : index
    %0 = vector.load %arg1[%c0, %c0_0, %c0_1] : memref<2x16x128xbf16, #tpu.memory_space<vmem>>, vector<2x16x128xbf16>
    %1 = vector.shape_cast %0 : vector<2x16x128xbf16> to vector<32x128xbf16>
    %c0_2 = arith.constant 0 : index
    %c0_3 = arith.constant 0 : index
    %2 = vector.load %arg2[%c0_2, %c0_3] : memref<128x256xbf16, #tpu.memory_space<vmem>>, vector<128x256xbf16>
    %cst = arith.constant dense<0.000000e+00> : vector<32x256xf32>
    %3 = tpu.matmul %1, %2, %cst {dimension_numbers = #tpu.dot_dimension_numbers<[1], [0], [0], [1], [0, 0, 1, 1], [], []>} : vector<32x128xbf16>, vector<128x256xbf16>, vector<32x256xf32> -> vector<32x256xf32>
    %c0_4 = arith.constant 0 : index
    %c0_5 = arith.constant 0 : index
    %4 = vector.load %arg3[%c0_4, %c0_5] : memref<1x256xf32, #tpu.memory_space<vmem>>, vector<1x256xf32>
    %5 = vector.broadcast %4 : vector<1x256xf32> to vector<32x256xf32>
    %6 = arith.addf %3, %5 : vector<32x256xf32>
    %7 = vector.extract_strided_slice %6 {offsets = [0, 0], sizes = [32, 128], strides = [1, 1]} : vector<32x256xf32> to vector<32x128xf32>
    %8 = vector.extract_strided_slice %6 {offsets = [0, 128], sizes = [32, 128], strides = [1, 1]} : vector<32x256xf32> to vector<32x128xf32>
    %9 = arith.mulf %7, %7 : vector<32x128xf32>
    %cst_6 = arith.constant dense<0.000000e+00> : vector<32xf32>
    %10 = vector.multi_reduction <add>, %9, %cst_6 [1] : vector<32x128xf32> to vector<32xf32>
    %11 = vector.shape_cast %10 : vector<32xf32> to vector<32x1xf32>
    %cst_7 = arith.constant 1.000000e-24 : f32
    %12 = vector.broadcast %cst_7 : f32 to vector<32x1xf32>
    %13 = arith.maximumf %11, %12 : vector<32x1xf32>
    %14 = math.rsqrt %13 : vector<32x1xf32>
    %15 = vector.broadcast %14 : vector<32x1xf32> to vector<32x128xf32>
    %16 = arith.mulf %7, %15 : vector<32x128xf32>
    %17 = arith.mulf %8, %8 : vector<32x128xf32>
    %cst_8 = arith.constant dense<0.000000e+00> : vector<32xf32>
    %18 = vector.multi_reduction <add>, %17, %cst_8 [1] : vector<32x128xf32> to vector<32xf32>
    %19 = vector.shape_cast %18 : vector<32xf32> to vector<32x1xf32>
    %cst_9 = arith.constant 1.000000e-24 : f32
    %20 = vector.broadcast %cst_9 : f32 to vector<32x1xf32>
    %21 = arith.maximumf %19, %20 : vector<32x1xf32>
    %22 = math.rsqrt %21 : vector<32x1xf32>
    %23 = vector.broadcast %22 : vector<32x1xf32> to vector<32x128xf32>
    %24 = arith.mulf %8, %23 : vector<32x128xf32>
    %c0_10 = arith.constant 0 : index
    %c0_11 = arith.constant 0 : index
    %25 = vector.load %arg4[%c0_10, %c0_11] : memref<1x128xf32, #tpu.memory_space<vmem>>, vector<1x128xf32>
    %26 = vector.broadcast %25 : vector<1x128xf32> to vector<32x128xf32>
    %27 = arith.mulf %16, %26 : vector<32x128xf32>
    %cst_12 = arith.constant dense<0.000000e+00> : vector<32xf32>
    %28 = vector.multi_reduction <add>, %27, %cst_12 [1] : vector<32x128xf32> to vector<32xf32>
    %29 = vector.shape_cast %28 : vector<32xf32> to vector<32x1xf32>
    %cst_13 = arith.constant 2.500000e-01 : f32
    %30 = vector.broadcast %cst_13 : f32 to vector<32x1xf32>
    %31 = arith.mulf %29, %30 : vector<32x1xf32>
    %32 = vector.shape_cast %31 : vector<32x1xf32> to vector<2x16x1xf32>
    %33 = tpu.iota {dimensions = array<i32: 1>} : vector<2x16x1xi32>
    %c8_i32 = arith.constant 8 : i32
    %34 = vector.broadcast %c8_i32 : i32 to vector<2x16x1xi32>
    %35 = arith.cmpi slt, %33, %34 : vector<2x16x1xi32>
    %cst_14 = arith.constant 0.000000e+00 : f32
    %36 = vector.broadcast %cst_14 : f32 to vector<2x16x1xf32>
    %37 = arith.select %35, %32, %36 : vector<2x16x1xi1>, vector<2x16x1xf32>
    %38 = arith.mulf %37, %37 : vector<2x16x1xf32>
    %cst_15 = arith.constant dense<0.000000e+00> : vector<2x1xf32>
    %39 = vector.multi_reduction <add>, %38, %cst_15 [1] : vector<2x16x1xf32> to vector<2x1xf32>
    %40 = vector.shape_cast %39 : vector<2x1xf32> to vector<2x1x1xf32>
    %cst_16 = arith.constant 1.000000e-24 : f32
    %41 = vector.broadcast %cst_16 : f32 to vector<2x1x1xf32>
    %42 = arith.maximumf %40, %41 : vector<2x1x1xf32>
    %43 = math.rsqrt %42 : vector<2x1x1xf32>
    %44 = vector.broadcast %43 : vector<2x1x1xf32> to vector<2x16x1xf32>
    %45 = arith.mulf %37, %44 : vector<2x16x1xf32>
    %46 = vector.shape_cast %16 : vector<32x128xf32> to vector<2x16x128xf32>
    %47 = vector.shape_cast %24 : vector<32x128xf32> to vector<2x16x128xf32>
    %48 = vector.broadcast %45 : vector<2x16x1xf32> to vector<2x16x128xf32>
    %49 = arith.mulf %48, %46 : vector<2x16x128xf32>
    %cst_17 = arith.constant dense<0.000000e+00> : vector<2x128xf32>
    %50 = vector.multi_reduction <add>, %49, %cst_17 [1] : vector<2x16x128xf32> to vector<2x128xf32>
    %51 = vector.shape_cast %50 : vector<2x128xf32> to vector<2x1x128xf32>
    %52 = vector.broadcast %51 : vector<2x1x128xf32> to vector<2x16x128xf32>
    %53 = arith.mulf %52, %47 : vector<2x16x128xf32>
    %54 = vector.shape_cast %53 : vector<2x16x128xf32> to vector<32x128xf32>
    %55 = arith.truncf %54 : vector<32x128xf32> to vector<32x128xbf16>
    %c0_18 = arith.constant 0 : index
    %c0_19 = arith.constant 0 : index
    %56 = vector.load %arg5[%c0_18, %c0_19] : memref<128x128xbf16, #tpu.memory_space<vmem>>, vector<128x128xbf16>
    %cst_20 = arith.constant dense<0.000000e+00> : vector<32x128xf32>
    %57 = tpu.matmul %55, %56, %cst_20 {dimension_numbers = #tpu.dot_dimension_numbers<[1], [0], [0], [1], [0, 0, 1, 1], [], []>} : vector<32x128xbf16>, vector<128x128xbf16>, vector<32x128xf32> -> vector<32x128xf32>
    %58 = arith.truncf %16 : vector<32x128xf32> to vector<32x128xbf16>
    %c0_21 = arith.constant 0 : index
    %c0_22 = arith.constant 0 : index
    %59 = vector.load %arg6[%c0_21, %c0_22] : memref<128x128xbf16, #tpu.memory_space<vmem>>, vector<128x128xbf16>
    %cst_23 = arith.constant dense<0.000000e+00> : vector<32x128xf32>
    %60 = tpu.matmul %58, %59, %cst_23 {dimension_numbers = #tpu.dot_dimension_numbers<[1], [0], [0], [1], [0, 0, 1, 1], [], []>} : vector<32x128xbf16>, vector<128x128xbf16>, vector<32x128xf32> -> vector<32x128xf32>
    %61 = arith.addf %57, %60 : vector<32x128xf32>
    %c0_24 = arith.constant 0 : index
    %c0_25 = arith.constant 0 : index
    %62 = vector.load %arg7[%c0_24, %c0_25] : memref<1x128xf32, #tpu.memory_space<vmem>>, vector<1x128xf32>
    %63 = vector.broadcast %62 : vector<1x128xf32> to vector<32x128xf32>
    %64 = arith.addf %61, %63 : vector<32x128xf32>
    %65 = vector.shape_cast %64 : vector<32x128xf32> to vector<2x16x128xf32>
    %c0_26 = arith.constant 0 : index
    %c0_27 = arith.constant 0 : index
    %c0_28 = arith.constant 0 : index
    %66 = vector.load %arg8[%c0_26, %c0_27, %c0_28] : memref<2x16x128xf32, #tpu.memory_space<vmem>>, vector<2x16x128xf32>
    tpu.vector_store %arg8[%c0_26, %c0_27, %c0_28], %65 {strides = array<i32>} : memref<2x16x128xf32, #tpu.memory_space<vmem>>, vector<2x16x128xf32>,
    return
  }
  func.func @transform_0(%arg0: i32) -> (i32, i32, i32) {
    %c0_i32 = arith.constant 0 : i32
    %c0_i32_0 = arith.constant 0 : i32
    %c0_i32_1 = arith.constant 0 : i32
    return %arg0, %c0_i32, %c0_i32_0 : i32, i32, i32
  }
  func.func @transform_1(%arg0: i32) -> (i32, i32) {
    %c0_i32 = arith.constant 0 : i32
    %c0_i32_0 = arith.constant 0 : i32
    %c0_i32_1 = arith.constant 0 : i32
    return %c0_i32, %c0_i32_0 : i32, i32
  }
  func.func @transform_2(%arg0: i32) -> (i32, i32) {
    %c0_i32 = arith.constant 0 : i32
    %c0_i32_0 = arith.constant 0 : i32
    %c0_i32_1 = arith.constant 0 : i32
    return %c0_i32, %c0_i32_0 : i32, i32
  }
  func.func @transform_3(%arg0: i32) -> (i32, i32) {
    %c0_i32 = arith.constant 0 : i32
    %c0_i32_0 = arith.constant 0 : i32
    %c0_i32_1 = arith.constant 0 : i32
    return %c0_i32, %c0_i32_0 : i32, i32
  }
  func.func @transform_4(%arg0: i32) -> (i32, i32) {
    %c0_i32 = arith.constant 0 : i32
    %c0_i32_0 = arith.constant 0 : i32
    %c0_i32_1 = arith.constant 0 : i32
    return %c0_i32, %c0_i32_0 : i32, i32
  }
  func.func @transform_5(%arg0: i32) -> (i32, i32) {
    %c0_i32 = arith.constant 0 : i32
    %c0_i32_0 = arith.constant 0 : i32
    %c0_i32_1 = arith.constant 0 : i32
    return %c0_i32, %c0_i32_0 : i32, i32
  }
  func.func @transform_6(%arg0: i32) -> (i32, i32) {
    %c0_i32 = arith.constant 0 : i32
    %c0_i32_0 = arith.constant 0 : i32
    %c0_i32_1 = arith.constant 0 : i32
    return %c0_i32, %c0_i32_0 : i32, i32
  }
  func.func @transform_7(%arg0: i32) -> (i32, i32, i32) {
    %c0_i32 = arith.constant 0 : i32
    %c0_i32_0 = arith.constant 0 : i32
    %c0_i32_1 = arith.constant 0 : i32
    return %arg0, %c0_i32, %c0_i32_0 : i32, i32, i32
  }
}

module attributes {stable_mosaic.version = 11 : i64} {
  func.func @_eaa_kernel(%arg0: i32, %arg1: memref<2x16x128xbf16, #tpu.memory_space<vmem>>, %arg2: memref<128x256xbf16, #tpu.memory_space<vmem>>, %arg3: memref<1x256xf32, #tpu.memory_space<vmem>>, %arg4: memref<1x128xf32, #tpu.memory_space<vmem>>, %arg5: memref<128x128xbf16, #tpu.memory_space<vmem>>, %arg6: memref<128x128xbf16, #tpu.memory_space<vmem>>, %arg7: memref<1x128xf32, #tpu.memory_space<vmem>>, %arg8: memref<2x16x128xf32, #tpu.memory_space<vmem>>) attributes {dimension_semantics = [#tpu.dimension_semantics<parallel>], iteration_bounds = array<i64: 1>, scalar_prefetch = 0 : i64, scratch_operands = 0 : i64, tpu.core_type = #tpu.core_type<tc>, window_params = [{transform_indices = @transform_0, window_bounds = array<i64: 2, 16, 128>}, {pipeline_mode = #tpu.pipeline_mode<synchronous>, transform_indices = @transform_1, window_bounds = array<i64: 128, 256>}, {pipeline_mode = #tpu.pipeline_mode<synchronous>, transform_indices = @transform_2, window_bounds = array<i64: 1, 256>}, {pipeline_mode = #tpu.pipeline_mode<synchronous>, transform_indices = @transform_3, window_bounds = array<i64: 1, 128>}, {pipeline_mode = #tpu.pipeline_mode<synchronous>, transform_indices = @transform_4, window_bounds = array<i64: 128, 128>}, {pipeline_mode = #tpu.pipeline_mode<synchronous>, transform_indices = @transform_5, window_bounds = array<i64: 128, 128>}, {pipeline_mode = #tpu.pipeline_mode<synchronous>, transform_indices = @transform_6, window_bounds = array<i64: 1, 128>}, {transform_indices = @transform_7, window_bounds = array<i64: 2, 16, 128>}]} {
    %c0 = arith.constant 0 : index
    %c0_0 = arith.constant 0 : index
    %c0_1 = arith.constant 0 : index
    %0 = vector.load %arg1[%c0, %c0_0, %c0_1] : memref<2x16x128xbf16, #tpu.memory_space<vmem>>, vector<2x16x128xbf16>
    %1 = vector.shape_cast %0 : vector<2x16x128xbf16> to vector<32x128xbf16>
    %c0_2 = arith.constant 0 : index
    %c0_3 = arith.constant 0 : index
    %2 = vector.load %arg2[%c0_2, %c0_3] : memref<128x256xbf16, #tpu.memory_space<vmem>>, vector<128x256xbf16>
    %cst = arith.constant dense<0.000000e+00> : vector<32x256xf32>
    %3 = tpu.matmul %1, %2, %cst {dimension_numbers = #tpu.dot_dimension_numbers<[1], [0], [0], [1], [0, 0, 1, 1], [], []>} : vector<32x128xbf16>, vector<128x256xbf16>, vector<32x256xf32> -> vector<32x256xf32>
    %c0_4 = arith.constant 0 : index
    %c0_5 = arith.constant 0 : index
    %4 = vector.load %arg3[%c0_4, %c0_5] : memref<1x256xf32, #tpu.memory_space<vmem>>, vector<1x256xf32>
    %5 = vector.broadcast %4 : vector<1x256xf32> to vector<32x256xf32>
    %6 = arith.addf %3, %5 : vector<32x256xf32>
    %7 = vector.extract_strided_slice %6 {offsets = [0, 0], sizes = [32, 128], strides = [1, 1]} : vector<32x256xf32> to vector<32x128xf32>
    %8 = vector.extract_strided_slice %6 {offsets = [0, 128], sizes = [32, 128], strides = [1, 1]} : vector<32x256xf32> to vector<32x128xf32>
    %9 = arith.mulf %7, %7 : vector<32x128xf32>
    %cst_6 = arith.constant dense<0.000000e+00> : vector<32xf32>
    %10 = vector.multi_reduction <add>, %9, %cst_6 [1] : vector<32x128xf32> to vector<32xf32>
    %11 = vector.shape_cast %10 : vector<32xf32> to vector<32x1xf32>
    %cst_7 = arith.constant 1.000000e-24 : f32
    %12 = vector.broadcast %cst_7 : f32 to vector<32x1xf32>
    %13 = arith.maximumf %11, %12 : vector<32x1xf32>
    %14 = math.rsqrt %13 : vector<32x1xf32>
    %15 = vector.broadcast %14 : vector<32x1xf32> to vector<32x128xf32>
    %16 = arith.mulf %7, %15 : vector<32x128xf32>
    %17 = arith.mulf %8, %8 : vector<32x128xf32>
    %cst_8 = arith.constant dense<0.000000e+00> : vector<32xf32>
    %18 = vector.multi_reduction <add>, %17, %cst_8 [1] : vector<32x128xf32> to vector<32xf32>
    %19 = vector.shape_cast %18 : vector<32xf32> to vector<32x1xf32>
    %cst_9 = arith.constant 1.000000e-24 : f32
    %20 = vector.broadcast %cst_9 : f32 to vector<32x1xf32>
    %21 = arith.maximumf %19, %20 : vector<32x1xf32>
    %22 = math.rsqrt %21 : vector<32x1xf32>
    %23 = vector.broadcast %22 : vector<32x1xf32> to vector<32x128xf32>
    %24 = arith.mulf %8, %23 : vector<32x128xf32>
    %c0_10 = arith.constant 0 : index
    %c0_11 = arith.constant 0 : index
    %25 = vector.load %arg4[%c0_10, %c0_11] : memref<1x128xf32, #tpu.memory_space<vmem>>, vector<1x128xf32>
    %26 = vector.broadcast %25 : vector<1x128xf32> to vector<32x128xf32>
    %27 = arith.mulf %16, %26 : vector<32x128xf32>
    %cst_12 = arith.constant dense<0.000000e+00> : vector<32xf32>
    %28 = vector.multi_reduction <add>, %27, %cst_12 [1] : vector<32x128xf32> to vector<32xf32>
    %29 = vector.shape_cast %28 : vector<32xf32> to vector<32x1xf32>
    %cst_13 = arith.constant 2.500000e-01 : f32
    %30 = vector.broadcast %cst_13 : f32 to vector<32x1xf32>
    %31 = arith.mulf %29, %30 : vector<32x1xf32>
    %32 = vector.shape_cast %31 : vector<32x1xf32> to vector<2x16x1xf32>
    %33 = tpu.iota {dimensions = array<i32: 1>} : vector<2x16x1xi32>
    %c8_i32 = arith.constant 8 : i32
    %34 = vector.broadcast %c8_i32 : i32 to vector<2x16x1xi32>
    %35 = arith.cmpi slt, %33, %34 : vector<2x16x1xi32>
    %cst_14 = arith.constant 0.000000e+00 : f32
    %36 = vector.broadcast %cst_14 : f32 to vector<2x16x1xf32>
    %37 = arith.select %35, %32, %36 : vector<2x16x1xi1>, vector<2x16x1xf32>
    %38 = arith.mulf %37, %37 : vector<2x16x1xf32>
    %cst_15 = arith.constant dense<0.000000e+00> : vector<2x1xf32>
    %39 = vector.multi_reduction <add>, %38, %cst_15 [1] : vector<2x16x1xf32> to vector<2x1xf32>
    %40 = vector.shape_cast %39 : vector<2x1xf32> to vector<2x1x1xf32>
    %cst_16 = arith.constant 1.000000e-24 : f32
    %41 = vector.broadcast %cst_16 : f32 to vector<2x1x1xf32>
    %42 = arith.maximumf %40, %41 : vector<2x1x1xf32>
    %43 = math.rsqrt %42 : vector<2x1x1xf32>
    %44 = vector.broadcast %43 : vector<2x1x1xf32> to vector<2x16x1xf32>
    %45 = arith.mulf %37, %44 : vector<2x16x1xf32>
    %46 = vector.shape_cast %16 : vector<32x128xf32> to vector<2x16x128xf32>
    %47 = vector.shape_cast %24 : vector<32x128xf32> to vector<2x16x128xf32>
    %48 = vector.broadcast %45 : vector<2x16x1xf32> to vector<2x16x128xf32>
    %49 = arith.mulf %48, %46 : vector<2x16x128xf32>
    %cst_17 = arith.constant dense<0.000000e+00> : vector<2x128xf32>
    %50 = vector.multi_reduction <add>, %49, %cst_17 [1] : vector<2x16x128xf32> to vector<2x128xf32>
    %51 = vector.shape_cast %50 : vector<2x128xf32> to vector<2x1x128xf32>
    %52 = vector.broadcast %51 : vector<2x1x128xf32> to vector<2x16x128xf32>
    %53 = arith.mulf %52, %47 : vector<2x16x128xf32>
    %54 = vector.shape_cast %53 : vector<2x16x128xf32> to vector<32x128xf32>
    %55 = arith.truncf %54 : vector<32x128xf32> to vector<32x128xbf16>
    %c0_18 = arith.constant 0 : index
    %c0_19 = arith.constant 0 : index
    %56 = vector.load %arg5[%c0_18, %c0_19] : memref<128x128xbf16, #tpu.memory_space<vmem>>, vector<128x128xbf16>
    %cst_20 = arith.constant dense<0.000000e+00> : vector<32x128xf32>
    %57 = tpu.matmul %55, %56, %cst_20 {dimension_numbers = #tpu.dot_dimension_numbers<[1], [0], [0], [1], [0, 0, 1, 1], [], []>} : vector<32x128xbf16>, vector<128x128xbf16>, vector<32x128xf32> -> vector<32x128xf32>
    %58 = arith.truncf %16 : vector<32x128xf32> to vector<32x128xbf16>
    %c0_21 = arith.constant 0 : index
    %c0_22 = arith.constant 0 : index
    %59 = vector.load %arg6[%c0_21, %c0_22] : memref<128x128xbf16, #tpu.memory_space<vmem>>, vector<128x128xbf16>
    %cst_23 = arith.constant dense<0.000000e+00> : vector<32x128xf32>
    %60 = tpu.matmul %58, %59, %cst_23 {dimension_numbers = #tpu.dot_dimension_numbers<[1], [0], [0], [1], [0, 0, 1, 1], [], []>} : vector<32x128xbf16>, vector<128x128xbf16>, vector<32x128xf32> -> vector<32x128xf32>
    %61 = arith.addf %57, %60 : vector<32x128xf32>
    %c0_24 = arith.constant 0 : index
    %c0_25 = arith.constant 0 : index
    %62 = vector.load %arg7[%c0_24, %c0_25] : memref<1x128xf32, #tpu.memory_space<vmem>>, vector<1x128xf32>
    %63 = vector.broadcast %62 : vector<1x128xf32> to vector<32x128xf32>
    %64 = arith.addf %61, %63 : vector<32x128xf32>
    %65 = vector.shape_cast %64 : vector<32x128xf32> to vector<2x16x128xf32>
    %c0_26 = arith.constant 0 : index
    %c0_27 = arith.constant 0 : index
    %c0_28 = arith.constant 0 : index
    %66 = vector.load %arg8[%c0_26, %c0_27, %c0_28] : memref<2x16x128xf32, #tpu.memory_space<vmem>>, vector<2x16x128xf32>
    tpu.vector_store %arg8[%c0_26, %c0_27, %c0_28], %65 {strides = array<i32>} : memref<2x16x128xf32, #tpu.memory_space<vmem>>, vector<2x16x128xf32>,
    return
  }
  func.func @transform_0(%arg0: i32) -> (i32, i32, i32) {
    %c0_i32 = arith.constant 0 : i32
    %c0_i32_0 = arith.constant 0 : i32
    %c0_i32_1 = arith.constant 0 : i32
    return %arg0, %c0_i32, %c0_i32_0 : i32, i32, i32
  }
  func.func @transform_1(%arg0: i32) -> (i32, i32) {
    %c0_i32 = arith.constant 0 : i32
    %c0_i32_0 = arith.constant 0 : i32
    %c0_i32_1 = arith.constant 0 : i32
    return %c0_i32, %c0_i32_0 : i32, i32
  }
  func.func @transform_2(%arg0: i32) -> (i32, i32) {
    %c0_i32 = arith.constant 0 : i32
    %c0_i32_0 = arith.constant 0 : i32
    %c0_i32_1 = arith.constant 0 : i32
    return %c0_i32, %c0_i32_0 : i32, i32
  }
  func.func @transform_3(%arg0: i32) -> (i32, i32) {
    %c0_i32 = arith.constant 0 : i32
    %c0_i32_0 = arith.constant 0 : i32
    %c0_i32_1 = arith.constant 0 : i32
    return %c0_i32, %c0_i32_0 : i32, i32
  }
  func.func @transform_4(%arg0: i32) -> (i32, i32) {
    %c0_i32 = arith.constant 0 : i32
    %c0_i32_0 = arith.constant 0 : i32
    %c0_i32_1 = arith.constant 0 : i32
    return %c0_i32, %c0_i32_0 : i32, i32
  }
  func.func @transform_5(%arg0: i32) -> (i32, i32) {
    %c0_i32 = arith.constant 0 : i32
    %c0_i32_0 = arith.constant 0 : i32
    %c0_i32_1 = arith.constant 0 : i32
    return %c0_i32, %c0_i32_0 : i32, i32
  }
  func.func @transform_6(%arg0: i32) -> (i32, i32) {
    %c0_i32 = arith.constant 0 : i32
    %c0_i32_0 = arith.constant 0 : i32
    %c0_i32_1 = arith.constant 0 : i32
    return %c0_i32, %c0_i32_0 : i32, i32
  }
  func.func @transform_7(%arg0: i32) -> (i32, i32, i32) {
    %c0_i32 = arith.constant 0 : i32
    %c0_i32_0 = arith.constant 0 : i32
    %c0_i32_1 = arith.constant 0 : i32
    return %arg0, %c0_i32, %c0_i32_0 : i32, i32, i32
  }
}

</mosaic_0001>

<bundles_post_ra>
// kernel: tpu_custom_call.1
= control target key start
LH: loop header
LB: loop body
LE: loop exit
PB: predicated region body
PF: predicated region fallthrough
CT: control target
= control target key end

     0   :  { %12 = vsyncpa [#allocation3], 0  ;;  %s1122_s0 = inlined_call_operand.hbm [shape: bf16[2,16,128], index: 0, kind: input, shape index: {}]   ;;  %s1123_s1 = inlined_call_operand.hbm [shape: bf16[128,256], index: 1, kind: input, shape index: {}]   ;;  %s1124_s2 = inlined_call_operand.vmem [shape: f32[1,256], index: 2, kind: input, shape index: {}]   ;;  %s1125_s3 = inlined_call_operand.vmem [shape: f32[1,128], index: 3, kind: input, shape index: {}]   ;;  %s1126_s4 = inlined_call_operand.hbm [shape: bf16[128,128], index: 4, kind: input, shape index: {}]   ;;  %s1127_s5 = inlined_call_operand.hbm [shape: bf16[128,128], index: 5, kind: input, shape index: {}]   ;;  %s1128_s6 = inlined_call_operand.vmem [shape: f32[1,128], index: 6, kind: input, shape index: {}]   ;;  %s1129_s7 = inlined_call_operand.hbm [shape: f32[2,16,128], index: 7, kind: output, shape index: {}]  }
   0x1   :  { %13 = vsyncpa [#allocation6], 0 }
   0x2   :  { %14 = vsyncpa [#allocation9], 0 }
   0x3   :  { %15 = vsyncpa [#allocation4], 0  ;;  %s942_s24 = smov [#allocation5]   ;;  %s824_s28 = scalar_lea.hbm %s1123_s1, 2048 }
   0x4   :  { %s33_s25 = sshll.u32 %s942_s24, 4  ;;  %p825_p0 = scmp.ne.s32.totalorder %s1123_s1, %s824_s28  ;;  %s34_s25 = int_to_ptr.vmem [resolvable:$true] %s33_s25 }
   0x5   :  { %p828_p1 = scmp.lt.u32.totalorder %s824_s28, %s1123_s1 }
   0x7   :  { %p830_p2 = pnand %p828_p1, %p825_p0 }
   0x9   :  { %833 = shalt.err (!%p830_p2)
}
   0xa   :  { %s834_s10 = scalar_lea.vmem %s34_s25, 2048  ;;  %p839_p4 = scmp.lt.s32.totalorder %s34_s25, %s34_s25 }
   0xb   :  { %p835_p3 = scmp.ne.s32.totalorder %s34_s25, %s834_s10  ;;  %p840_p5 = scmp.lt.s32.totalorder %s834_s10, %s834_s10 }
   0xd   :  { %p841_p6 = por %p840_p5, %p839_p4 }
   0xf   :  { %p842_p7 = pnand %p841_p6, %p835_p3 }
  0x11   :  { %845 = shalt.err (!%p842_p7)
}
  0x12   :  { %s943_s11 = smov 128   ;;  %s944_s12 = smov 8  }
  0x13   :  { %39 = dma.hbm_to_vmem [thread:$0]  %s1123_s1, 2048, %s34_s25, [#allocation6], %s943_s11, %s943_s11, %s944_s12  }
  0x14   :  { %s945_s15 = smov [#allocation2]   ;;  %s846_s19 = scalar_lea.hbm %s1122_s0, 256 }
  0x15   :  { %s21_s16 = sshll.u32 %s945_s15, 4  ;;  %p847_p8 = scmp.ne.s32.totalorder %s1122_s0, %s846_s19  ;;  %s22_s16 = int_to_ptr.vmem [resolvable:$true] %s21_s16 }
  0x16   :  { %p850_p9 = scmp.lt.u32.totalorder %s846_s19, %s1122_s0 }
  0x18   :  { %p852_p10 = pnand %p850_p9, %p847_p8 }
  0x1a   :  { %855 = shalt.err (!%p852_p10)
}
  0x1b   :  { %s856_s24 = scalar_lea.vmem %s22_s16, 256  ;;  %p861_p12 = scmp.lt.s32.totalorder %s22_s16, %s22_s16 }
  0x1c   :  { %p857_p11 = scmp.ne.s32.totalorder %s22_s16, %s856_s24  ;;  %p862_p13 = scmp.lt.s32.totalorder %s856_s24, %s856_s24 }
  0x1e   :  { %p863_p0 = por %p862_p13, %p861_p12 }
  0x20   :  { %p864_p1 = pnand %p863_p0, %p857_p11 }
  0x22   :  { %867 = shalt.err (!%p864_p1)
}
  0x23   :  { %s946_s1 = smov 64   ;;  %s947_s25 = smov 4  }
  0x24   :  { %27 = dma.hbm_to_vmem [thread:$0]  %s1122_s0, 256, %s22_s16, [#allocation3], %s946_s1, %s946_s1, %s947_s25  }
  0x25   :  { %s948_s28 = smov [#allocation7]   ;;  %s949_s30 = smov [#allocation8]  }
  0x26   :  { %s49_s29 = sshll.u32 %s948_s28, 4  ;;  %s61_s8 = sshll.u32 %s949_s30, 4  ;;  %s50_s29 = int_to_ptr.vmem [resolvable:$true] %s49_s29  ;;  %s1022_s8 = int_to_ptr.vmem [resolvable:$true] %s61_s8 }
  0x27   :  { %s868_s13 = scalar_lea.hbm %s1126_s4, 1024 }
  0x28   :  { %p869_p2 = scmp.ne.s32.totalorder %s1126_s4, %s868_s13  ;;  %p872_p3 = scmp.lt.u32.totalorder %s868_s13, %s1126_s4 }
  0x2a   :  { %p874_p4 = pnand %p872_p3, %p869_p2 }
  0x2c   :  { %877 = shalt.err (!%p874_p4)
}
  0x2d   :  { %s878_s0 = scalar_lea.vmem %s50_s29, 1024  ;;  %p883_p6 = scmp.lt.s32.totalorder %s50_s29, %s50_s29 }
  0x2e   :  { %p879_p5 = scmp.ne.s32.totalorder %s50_s29, %s878_s0  ;;  %p884_p7 = scmp.lt.s32.totalorder %s878_s0, %s878_s0 }
  0x30   :  { %p885_p8 = por %p884_p7, %p883_p6 }
  0x32   :  { %p886_p9 = pnand %p885_p8, %p879_p5 }
  0x34   :  { %889 = shalt.err (!%p886_p9)
}
  0x35   :  { %55 = dma.hbm_to_vmem [thread:$0]  %s1126_s4, 1024, %s50_s29, [#allocation6], %s946_s1, %s946_s1, %s947_s25  }
  0x36   :  { %s890_s22 = scalar_lea.hbm %s1127_s5, 1024 }
  0x37   :  { %p891_p10 = scmp.ne.s32.totalorder %s1127_s5, %s890_s22  ;;  %p894_p11 = scmp.lt.u32.totalorder %s890_s22, %s1127_s5 }
  0x39   :  { %p896_p12 = pnand %p894_p11, %p891_p10 }
  0x3b   :  { %899 = shalt.err (!%p896_p12)
}
  0x3c   :  { %s900_s28 = scalar_lea.vmem %s1022_s8, 1024  ;;  %p905_p0 = scmp.lt.s32.totalorder %s1022_s8, %s1022_s8 }
  0x3d   :  { %p901_p13 = scmp.ne.s32.totalorder %s1022_s8, %s900_s28  ;;  %p906_p1 = scmp.lt.s32.totalorder %s900_s28, %s900_s28 }
  0x3f   :  { %p907_p2 = por %p906_p1, %p905_p0 }
  0x41   :  { %p908_p3 = pnand %p907_p2, %p901_p13 }
  0x43   :  { %911 = shalt.err (!%p908_p3)
}
  0x44   :  { %67 = dma.hbm_to_vmem [thread:$0]  %s1127_s5, 1024, %s1022_s8, [#allocation9], %s946_s1, %s946_s1, %s947_s25  }
  0x45   :  { %934 = dma.done.wait [#allocation3], 256  }
  0x46   :  { %935 = vsyncadd [#allocation3], 4294967040 }
  0x47   :  { %936 = dma.done.wait [#allocation6], 3072  }
  0x48   :  { %937 = vsyncadd [#allocation6], 4294964224 }
  0x49   :  { %938 = dma.done.wait [#allocation9], 1024  }
  0x4a   :  { %939 = vsyncadd [#allocation9], 4294966272  ;;  %v950_v0 = vmov 0   ;;  %v762_v1 = vld [vmem:[#allocation5 + $0x4] ss:$8 sps:$4 sm:$0xff]   ;;  %v786_v17 = vld [vmem:[#allocation2] sm:$0xff]   ;;  %v105_v19 = vlaneseq }
  0x4b   :  { %239 = vmatprep.mubr.bf16.mxu0 %v950_v0  ;;  %v764_v2 = vld [vmem:[#allocation5] ss:$8 sps:$4 sm:$0xff]   ;;  %207 = vmatprep.subr.bf16.mxu0 %v762_v1  ;;  %v765_v3 = vld [vmem:[#allocation5 + $0x14] ss:$8 sps:$4 sm:$0xff]   ;;  %v767_v4 = vld [vmem:[#allocation5 + $0x10] ss:$8 sps:$4 sm:$0xff]  }
  0x4c   :  { %208 = vmatpush1.bf16.msra.mxu0 %v764_v2  ;;  %v768_v5 = vld [vmem:[#allocation5 + $0x24] ss:$8 sps:$4 sm:$0xff]   ;;  %v770_v6 = vld [vmem:[#allocation5 + $0x20] ss:$8 sps:$4 sm:$0xff]   ;;  %v771_v7 = vld [vmem:[#allocation5 + $0x34] ss:$8 sps:$4 sm:$0xff]  }
  0x4d   :  { %209 = vmatprep.subr.bf16.mxu0 %v765_v3  ;;  %v773_v8 = vld [vmem:[#allocation5 + $0x30] ss:$8 sps:$4 sm:$0xff]   ;;  %v774_v9 = vld [vmem:[#allocation5 + $0x44] ss:$8 sps:$4 sm:$0xff]   ;;  %v776_v10 = vld [vmem:[#allocation5 + $0x40] ss:$8 sps:$4 sm:$0xff]  }
  0x4e   :  { %v777_v11 = vld [vmem:[#allocation5 + $0x54] ss:$8 sps:$4 sm:$0xff]   ;;  %v779_v12 = vld [vmem:[#allocation5 + $0x50] ss:$8 sps:$4 sm:$0xff]   ;;  %v780_v13 = vld [vmem:[#allocation5 + $0x64] ss:$8 sps:$4 sm:$0xff]  }
  0x4f   :  { %v782_v14 = vld [vmem:[#allocation5 + $0x60] ss:$8 sps:$4 sm:$0xff]   ;;  %v783_v15 = vld [vmem:[#allocation5 + $0x74] ss:$8 sps:$4 sm:$0xff]   ;;  %v785_v16 = vld [vmem:[#allocation5 + $0x70] ss:$8 sps:$4 sm:$0xff]  }
  0x50   :  { %210 = vmatpush1.bf16.msra.mxu0 %v767_v4  ;;  %v787_v18 = vld [vmem:[#allocation2 + $0x8] sm:$0xff]   ;;  %v106_v20 = vshrl.u32 %v105_v19, 7  ;;  %v103_v22 = vld [vmem:[%s1124_s2] sm:$0x3]  ;;  %v788_v47 = vld [vmem:[#allocation8] sm:$0xff]   ;;  %s951_s8 = smov [#allocation10]  }
  0x51   :  { %211 = vmatprep.subr.bf16.mxu0 %v768_v5  ;;  %708 = vmatprep.subr.bf16.mxu1 %v788_v47  ;;  %v670_v55 = vld [vmem:[%s1125_s3] ss:$0 sm:$0xff]  ;;  %v789_v1 = vld [vmem:[#allocation8 + $0x8] sm:$0xff]   ;;  %v791_v5 = vld [vmem:[#allocation8 + $0x18] sm:$0xff]   ;;  %s638_s9 = sshll.u32 %s951_s8, 4  ;;  %s639_s9 = int_to_ptr.vmem [resolvable:$true] %s638_s9 }
  0x52   :  { %v107_v21 = vsub.s32 0, %v106_v20  ;;  %v111_v24 = vsub.s32 1, %v106_v20  ;;  %709 = vmatpush3.bf16.msra.mxu1 %v788_v47  ;;  %v790_v3 = vld [vmem:[#allocation8 + $0x10] sm:$0xff]   ;;  %s912_s10 = scalar_lea.vmem %s639_s9, 512  ;;  %p917_p5 = scmp.lt.s32.totalorder %s639_s9, %s639_s9 }
  0x53   :  { %710 = vmatprep.subr.bf16.mxu1 %v789_v1  ;;  %p913_p4 = scmp.ne.s32.totalorder %s639_s9, %s912_s10  ;;  %p918_p6 = scmp.lt.s32.totalorder %s912_s10, %s912_s10 }
  0x54   :  { %212 = vmatpush1.bf16.msra.mxu0 %v770_v6  ;;  %v108_v23 = vrot.slane %v103_v22, %v107_v21  ;;  %v112_v28 = vrot.slane %v103_v22, %v111_v24  ;;  %v792_v6 = vld [vmem:[#allocation8 + $0x20] sm:$0xff]  }
  0x55   :  { %213 = vmatprep.subr.bf16.mxu0 %v771_v7  ;;  %v793_v7 = vld [vmem:[#allocation8 + $0x28] sm:$0xff]   ;;  %p919_p7 = por %p918_p6, %p917_p5 }
  0x56   :  { %711 = vmatpush3.bf16.msra.mxu1 %v789_v1 }
  0x57   :  { %712 = vmatprep.subr.bf16.mxu1 %v790_v3  ;;  %p920_p8 = pnand %p919_p7, %p913_p4 }
  0x58   :  { %214 = vmatpush1.bf16.msra.mxu0 %v773_v8  ;;  %v794_v8 = vld [vmem:[#allocation8 + $0x30] sm:$0xff]  }
  0x59   :  { %215 = vmatprep.subr.bf16.mxu0 %v774_v9  ;;  %v795_v9 = vld [vmem:[#allocation8 + $0x38] sm:$0xff]  }
  0x5a   :  { %713 = vmatpush3.bf16.msra.mxu1 %v790_v3 }
  0x5b   :  { %714 = vmatprep.subr.bf16.mxu1 %v791_v5 }
  0x5c   :  { %216 = vmatpush1.bf16.msra.mxu0 %v776_v10  ;;  %v796_v10 = vld [vmem:[#allocation7] sm:$0xff]  }
  0x5d   :  { %217 = vmatprep.subr.bf16.mxu0 %v777_v11 }
  0x5e   :  { %715 = vmatpush3.bf16.msra.mxu1 %v791_v5 }
  0x5f   :  { %716 = vmatprep.subr.bf16.mxu1 %v792_v6 }
  0x60   :  { %218 = vmatpush1.bf16.msra.mxu0 %v779_v12 }
  0x61   :  { %219 = vmatprep.subr.bf16.mxu0 %v780_v13 }
  0x62   :  { %717 = vmatpush3.bf16.msra.mxu1 %v792_v6 }
  0x63   :  { %718 = vmatprep.subr.bf16.mxu1 %v793_v7 }
  0x64   :  { %220 = vmatpush1.bf16.msra.mxu0 %v782_v14 }
  0x65   :  { %221 = vmatprep.subr.bf16.mxu0 %v783_v15 }
  0x66   :  { %719 = vmatpush3.bf16.msra.mxu1 %v793_v7 }
  0x67   :  { %720 = vmatprep.subr.bf16.mxu1 %v794_v8 }
  0x68   :  { %222 = vmatpush1.bf16.msra.mxu0 %v785_v16 }
  0x6a   :  { %721 = vmatpush3.bf16.msra.mxu1 %v794_v8  ;;  %v801_v8 = vld [vmem:[#allocation7 + $0x28] sm:$0xff]  }
  0x6b   :  { %240 = vmatmul.mubr.bf16.vlgmr.msra.gmra.mrb[0].mxu0 %v786_v17  ;;  %722 = vmatprep.subr.bf16.mxu1 %v795_v9 }
  0x6c   :  { %249 = vmatprep.mubr.bf16.mxu0 %v950_v0 }
  0x6e   :  { %723 = vmatpush3.bf16.msra.mxu1 %v795_v9 }
  0x6f   :  { %728 = vmatprep.subr.bf16.mxu1 %v796_v10 }
  0x73   :  { %250 = vmatmul.mubr.bf16.gmra.mrb[4].mxu0 %v787_v18 }
 0x13e   :  { %v241_v25 = vpop.f32.mrb[0].mxu0 }
 0x13f   :  { %v242_v26 = vadd.f32 %v241_v25, %v108_v23  ;;  %v243_v27 = vpop.f32.mrb[1].mxu0 }
 0x140   :  { %v245_v29 = vpop.f32.mrb[2].mxu0  ;;  %v1068_v42 = vadd.f32 %v243_v27, %v112_v28 }
 0x141   :  { %v247_v30 = vpop.f32.mrb[3].mxu0  ;;  %v260_v31 = vmul.f32 %v242_v26, %v242_v26  ;;  %v246_v37 = vadd.f32 %v245_v29, %v108_v23 }
 0x142   :  { %v1062_v32 = vadd.f32 %v247_v30, %v112_v28  ;;  %v284_v45 = vmul.f32 %v1068_v42, %v1068_v42 }
 0x143   :  { %264 = vadd.xlane.f32.xlu0 %v260_v31  ;;  %v261_v43 = vmul.f32 %v246_v37, %v246_v37 }
 0x144   :  { %v285_v2 = vmul.f32 %v1062_v32, %v1062_v32 }
 0x146   :  { %v251_v33 = vpop.f32.mrb[4].mxu0 }
 0x147   :  { %v252_v34 = vadd.f32 %v251_v33, %v108_v23  ;;  %v253_v35 = vpop.f32.mrb[5].mxu0 }
 0x148   :  { %v255_v36 = vpop.f32.mrb[6].mxu0  ;;  %v1070_v44 = vadd.f32 %v253_v35, %v112_v28 }
 0x149   :  { %v1064_v38 = vadd.f32 %v255_v36, %v108_v23  ;;  %v257_v39 = vpop.f32.mrb[7].mxu0  ;;  %v262_v40 = vmul.f32 %v252_v34, %v252_v34 }
 0x14a   :  { %v1066_v41 = vadd.f32 %v257_v39, %v112_v28  ;;  %v286_v46 = vmul.f32 %v1070_v44, %v1070_v44 }
 0x14b   :  { %268 = vadd.xlane.f32.xlu0 %v262_v40  ;;  %v263_v63 = vmul.f32 %v1064_v38, %v1064_v38 }
 0x14c   :  { %v287_v4 = vmul.f32 %v1066_v41, %v1066_v41 }
 0x14f   :  { %266 = vadd.xlane.f32.xlu0 %v261_v43  ;;  %v797_v43 = vld [vmem:[#allocation7 + $0x8] sm:$0xff]  }
 0x153   :  { %288 = vadd.xlane.f32.xlu0 %v284_v45 }
 0x157   :  { %292 = vadd.xlane.f32.xlu0 %v286_v46 }
 0x1d0   :  { %v265_v48 = vpop.xlane.xlu0 %264 }
 0x1d1   :  { %v272_v49 = vmax.f32 %v265_v48, 1e-24 }
 0x1d3   :  { %804 = vrsqrt.f32 %v272_v49 }
 0x1d8   :  { %v269_v50 = vpop.xlane.xlu0 %268 }
 0x1d9   :  { %v274_v51 = vmax.f32 %v269_v50, 1e-24 }
 0x1db   :  { %806 = vrsqrt.f32 %v274_v51  ;;  %v798_v51 = vld [vmem:[#allocation7 + $0x10] sm:$0xff]  }
 0x1dc   :  { %v267_v52 = vpop.xlane.xlu0 %266 }
 0x1dd   :  { %v805_v53 = vpop.eup %804  ;;  %v273_v54 = vmax.f32 %v267_v52, 1e-24 }
 0x1de   :  { %v1079_v56 = vmul.f32 %v805_v53, %v242_v26 }
 0x1df   :  { %808 = vrsqrt.f32 %v273_v54 }
 0x1e0   :  { %v315_v57 = vmul.f32 %v670_v55, %v1079_v56 }
 0x1e2   :  { %319 = vadd.xlane.f32.xlu1 %v315_v57  ;;  %v799_v57 = vld [vmem:[#allocation7 + $0x18] sm:$0xff]  }
 0x1e5   :  { %v807_v58 = vpop.eup %806 }
 0x1e6   :  { %v1082_v59 = vmul.f32 %v807_v58, %v252_v34  ;;  %v289_v34 = vpop.xlane.xlu0 %288 }
 0x1e7   :  { %v296_v39 = vmax.f32 %v289_v34, 1e-24 }
 0x1e8   :  { %v317_v60 = vmul.f32 %v670_v55, %v1082_v59 }
 0x1e9   :  { %v809_v61 = vpop.eup %808 }
 0x1ea   :  { %323 = vadd.xlane.f32.xlu1 %v317_v60  ;;  %v1085_v62 = vmul.f32 %v809_v61, %v246_v37  ;;  %v293_v52 = vpop.xlane.xlu0 %292 }
 0x1eb   :  { %v298_v54 = vmax.f32 %v293_v52, 1e-24 }
 0x1ec   :  { %v406_v0 = vpack.c.bf16 %v1085_v62, %v1079_v56 }
 0x1ee   :  { %270 = vadd.xlane.f32.xlu1 %v263_v63  ;;  %724 = vmatprep.mubr.bf16.mxu1 %v406_v0 }
 0x1f2   :  { %290 = vadd.xlane.f32.xlu1 %v285_v2  ;;  %v800_v2 = vld [vmem:[#allocation7 + $0x20] sm:$0xff]  }
 0x1f6   :  { %294 = vadd.xlane.f32.xlu1 %v287_v4 }
 0x26f   :  { %v320_v11 = vpop.xlane.xlu1 %319 }
 0x270   :  { %v327_v12 = vmul.f32 0.25, %v320_v11 }
 0x272   :  { %v340_v13 = vmul.f32 %v327_v12, %v327_v12 }
 0x274   :  { %v345_v14 = vrot.slane %v340_v13, 4 }
 0x276   :  { %v346_v15 = vadd.f32 %v345_v14, %v340_v13 }
 0x277   :  { %v324_v16 = vpop.xlane.xlu1 %323 }
 0x278   :  { %v347_v17 = vrot.slane %v346_v15, 2  ;;  %v329_v18 = vmul.f32 0.25, %v324_v16  ;;  %v802_v16 = vld [vmem:[#allocation7 + $0x30] sm:$0xff]  }
 0x27a   :  { %v348_v19 = vadd.f32 %v347_v17, %v346_v15  ;;  %v342_v20 = vmul.f32 %v329_v18, %v329_v18 }
 0x27b   :  { %v271_v21 = vpop.xlane.xlu1 %270 }
 0x27c   :  { %v349_v22 = vrot.slane %v348_v19, 1  ;;  %v352_v23 = vrot.slane %v342_v20, 4  ;;  %v275_v24 = vmax.f32 %v271_v21, 1e-24  ;;  %v803_v21 = vld [vmem:[#allocation7 + $0x38] sm:$0xff]  }
 0x27e   :  { %v350_v25 = vadd.f32 %v349_v22, %v348_v19  ;;  %v353_v26 = vadd.f32 %v352_v23, %v342_v20  ;;  %810 = vrsqrt.f32 %v275_v24 }
 0x27f   :  { %v291_v36 = vpop.xlane.xlu1 %290 }
 0x280   :  { %v358_v27 = vmax.f32 %v350_v25, 1e-24  ;;  %v354_v28 = vrot.slane %v353_v26, 2  ;;  %v297_v46 = vmax.f32 %v291_v36, 1e-24 }
 0x282   :  { %812 = vrsqrt.f32 %v358_v27  ;;  %v355_v29 = vadd.f32 %v354_v28, %v353_v26  ;;  %v687_v27 = vld [vmem:[%s1128_s6] ss:$0 sm:$0xff] }
 0x283   :  { %v295_v53 = vpop.xlane.xlu1 %294 }
 0x284   :  { %v356_v30 = vrot.slane %v355_v29, 1  ;;  %v299_v60 = vmax.f32 %v295_v53, 1e-24 }
 0x286   :  { %v357_v31 = vadd.f32 %v356_v30, %v355_v29 }
 0x288   :  { %v811_v33 = vpop.eup %810  ;;  %v359_v35 = vmax.f32 %v357_v31, 1e-24 }
 0x289   :  { %v283_v37 = vmul.f32 %v811_v33, %v1064_v38 }
 0x28a   :  { %814 = vrsqrt.f32 %v359_v35 }
 0x28b   :  { %v407_v40 = vpack.c.bf16 %v283_v37, %v1082_v59  ;;  %816 = vrsqrt.f32 %v296_v39 }
 0x28c   :  { %v813_v45 = vpop.eup %812  ;;  %818 = vrsqrt.f32 %v297_v46 }
 0x28d   :  { %v362_v47 = vmul.f32 %v813_v45, %v327_v12  ;;  %v363_v48 = vmul.f32 0.0, %v813_v45  ;;  %725 = vmatmul.mubr.bf16.vlgmr.msra.gmra.mrb[0].mxu1 %v407_v40  ;;  %820 = vrsqrt.f32 %v298_v54 }
 0x28e   :  { %729 = vmatpush3.bf16.msra.mxu1 %v796_v10  ;;  %822 = vrsqrt.f32 %v299_v60 }
 0x28f   :  { %v366_v49 = vmul.f32 %v362_v47, %v1079_v56  ;;  %v367_v50 = vmul.f32 %v363_v48, %v1085_v62  ;;  %730 = vmatprep.subr.bf16.mxu1 %v797_v43 }
 0x291   :  { %v370_v38 = vadd.f32 %v367_v50, %v366_v49 }
 0x292   :  { %731 = vmatpush3.bf16.msra.mxu1 %v797_v43 }
 0x293   :  { %v371_v55 = vrot.slane %v370_v38, 4  ;;  %732 = vmatprep.subr.bf16.mxu1 %v798_v51 }
 0x294   :  { %v815_v58 = vpop.eup %814 }
 0x295   :  { %v372_v61 = vadd.f32 %v371_v55, %v370_v38  ;;  %v364_v63 = vmul.f32 %v815_v58, %v329_v18  ;;  %v365_v0 = vmul.f32 0.0, %v815_v58  ;;  %v817_v3 = vpop.eup %816 }
 0x296   :  { %733 = vmatpush3.bf16.msra.mxu1 %v798_v51  ;;  %v819_v6 = vpop.eup %818  ;;  %v304_v11 = vmul.f32 %v817_v3, %v1068_v42 }
 0x297   :  { %v373_v56 = vrot.slane %v372_v61, 2  ;;  %v368_v62 = vmul.f32 %v364_v63, %v1082_v59  ;;  %v369_v1 = vmul.f32 %v365_v0, %v283_v37  ;;  %734 = vmatprep.subr.bf16.mxu1 %v799_v57  ;;  %v305_v12 = vmul.f32 %v819_v6, %v1062_v32  ;;  %v821_v17 = vpop.eup %820 }
 0x298   :  { %v823_v20 = vpop.eup %822  ;;  %v306_v42 = vmul.f32 %v821_v17, %v1070_v44 }
 0x299   :  { %v377_v4 = vadd.f32 %v369_v1, %v368_v62  ;;  %v374_v5 = vadd.f32 %v373_v56, %v372_v61  ;;  %v307_v32 = vmul.f32 %v823_v20, %v1066_v41 }
 0x29a   :  { %735 = vmatpush3.bf16.msra.mxu1 %v799_v57 }
 0x29b   :  { %v378_v7 = vrot.slane %v377_v4, 4  ;;  %736 = vmatprep.subr.bf16.mxu1 %v800_v2  ;;  %v375_v9 = vrot.slane %v374_v5, 1 }
 0x29d   :  { %v379_v10 = vadd.f32 %v378_v7, %v377_v4  ;;  %v376_v13 = vadd.f32 %v375_v9, %v374_v5 }
 0x29e   :  { %737 = vmatpush3.bf16.msra.mxu1 %v800_v2 }
 0x29f   :  { %v380_v59 = vrot.slane %v379_v10, 2  ;;  %738 = vmatprep.subr.bf16.mxu1 %v801_v8  ;;  %v384_v14 = vmul.f32 %v376_v13, %v304_v11  ;;  %v385_v15 = vmul.f32 %v376_v13, %v305_v12 }
 0x2a1   :  { %v388_v18 = vpack.c.bf16 %v385_v15, %v384_v14  ;;  %v381_v19 = vadd.f32 %v380_v59, %v379_v10 }
 0x2a2   :  { %739 = vmatpush3.bf16.msra.mxu1 %v801_v8 }
 0x2a3   :  { %744 = vmatprep.mubr.bf16.mxu1 %v388_v18  ;;  %740 = vmatprep.subr.bf16.mxu1 %v802_v16  ;;  %v382_v22 = vrot.slane %v381_v19, 1 }
 0x2a5   :  { %v383_v23 = vadd.f32 %v382_v22, %v381_v19 }
 0x2a6   :  { %741 = vmatpush3.bf16.msra.mxu1 %v802_v16 }
 0x2a7   :  { %742 = vmatprep.subr.bf16.mxu1 %v803_v21  ;;  %v386_v24 = vmul.f32 %v383_v23, %v306_v42  ;;  %v387_v25 = vmul.f32 %v383_v23, %v307_v32 }
 0x2a9   :  { %v389_v26 = vpack.c.bf16 %v387_v25, %v386_v24 }
 0x2aa   :  { %743 = vmatpush3.bf16.msra.mxu1 %v803_v21 }
 0x2ad   :  { %745 = vmatmul.mubr.bf16.vlgmr.msra.gmra.mrb[0].mxu1 %v389_v26 }
 0x380   :  { %v746_v28 = vpop.f32.mrb[0].mxu1 }
 0x381   :  { %v627_v29 = vadd.f32 %v746_v28, %v687_v27  ;;  %v603_v30 = vpop.f32.mrb[1].mxu1 }
 0x382   :  { %v625_v44 = vadd.f32 %v687_v27, %v603_v30  ;;  %v747_v31 = vpop.f32.mrb[2].mxu1 }
 0x383   :  { %631 = vst [vmem:[#allocation10 + $0x10] sm:$0xff] %v627_v29  ;;  %v628_v41 = vadd.f32 %v747_v31, %v687_v27  ;;  %v606_v33 = vpop.f32.mrb[3].mxu1 }
 0x384   :  { %629 = vst [vmem:[#allocation10] sm:$0xff] %v625_v44  ;;  %v626_v34 = vadd.f32 %v687_v27, %v606_v33 }
 0x385   :  { %632 = vst [vmem:[#allocation10 + $0x18] sm:$0xff] %v628_v41 }
 0x386   :  { %630 = vst [vmem:[#allocation10 + $0x8] sm:$0xff] %v626_v34 }
 0x387   :  { %923 = shalt.err (!%p920_p8)
}
 0x388   :  { %s924_s14 = scalar_lea.hbm %s1129_s7, 512 }
 0x389   :  { %p925_p9 = scmp.ne.s32.totalorder %s1129_s7, %s924_s14  ;;  %p928_p10 = scmp.lt.u32.totalorder %s924_s14, %s1129_s7 }
 0x38b   :  { %p930_p11 = pnand %p928_p10, %p925_p9 }
 0x38d   :  { %933 = shalt.err (!%p930_p11)
}
 0x38e   :  { %644 = dma.vmem_to_hbm [thread:$0]  %s639_s9, 512, %s1129_s7, [#allocation4], %s943_s11, %s943_s11, %s944_s12  }
 0x38f   :  { %940 = dma.done.wait [#allocation4], 512  }
 0x390   :  { %941 = vsyncadd [#allocation4], 4294966784 }
 0x391   :  { %648 = vsyncpa [#allocation3], 1 }
 0x392   :  { %649 = vsyncpa [#allocation6], 1 }
 0x393   :  { %650 = vsyncpa [#allocation9], 1 }
 0x394   :  { %651 = vsyncpa [#allocation4], 1 }

// kernel: tpu_custom_call.1
= control target key start
LH: loop header
LB: loop body
LE: loop exit
PB: predicated region body
PF: predicated region fallthrough
CT: control target
= control target key end

     0   :  { %12 = vsyncpa [#allocation3], 0  ;;  %s1122_s0 = inlined_call_operand.hbm [shape: bf16[2,16,128], index: 0, kind: input, shape index: {}]   ;;  %s1123_s1 = inlined_call_operand.hbm [shape: bf16[128,256], index: 1, kind: input, shape index: {}]   ;;  %s1124_s2 = inlined_call_operand.vmem [shape: f32[1,256], index: 2, kind: input, shape index: {}]   ;;  %s1125_s3 = inlined_call_operand.vmem [shape: f32[1,128], index: 3, kind: input, shape index: {}]   ;;  %s1126_s4 = inlined_call_operand.hbm [shape: bf16[128,128], index: 4, kind: input, shape index: {}]   ;;  %s1127_s5 = inlined_call_operand.hbm [shape: bf16[128,128], index: 5, kind: input, shape index: {}]   ;;  %s1128_s6 = inlined_call_operand.vmem [shape: f32[1,128], index: 6, kind: input, shape index: {}]   ;;  %s1129_s7 = inlined_call_operand.hbm [shape: f32[2,16,128], index: 7, kind: output, shape index: {}]  }
   0x1   :  { %13 = vsyncpa [#allocation6], 0 }
   0x2   :  { %14 = vsyncpa [#allocation9], 0 }
   0x3   :  { %15 = vsyncpa [#allocation4], 0  ;;  %s942_s24 = smov [#allocation5]   ;;  %s824_s28 = scalar_lea.hbm %s1123_s1, 2048 }
   0x4   :  { %s33_s25 = sshll.u32 %s942_s24, 4  ;;  %p825_p0 = scmp.ne.s32.totalorder %s1123_s1, %s824_s28  ;;  %s34_s25 = int_to_ptr.vmem [resolvable:$true] %s33_s25 }
   0x5   :  { %p828_p1 = scmp.lt.u32.totalorder %s824_s28, %s1123_s1 }
   0x7   :  { %p830_p2 = pnand %p828_p1, %p825_p0 }
   0x9   :  { %833 = shalt.err (!%p830_p2)
}
   0xa   :  { %s834_s10 = scalar_lea.vmem %s34_s25, 2048  ;;  %p839_p4 = scmp.lt.s32.totalorder %s34_s25, %s34_s25 }
   0xb   :  { %p835_p3 = scmp.ne.s32.totalorder %s34_s25, %s834_s10  ;;  %p840_p5 = scmp.lt.s32.totalorder %s834_s10, %s834_s10 }
   0xd   :  { %p841_p6 = por %p840_p5, %p839_p4 }
   0xf   :  { %p842_p7 = pnand %p841_p6, %p835_p3 }
  0x11   :  { %845 = shalt.err (!%p842_p7)
}
  0x12   :  { %s943_s11 = smov 128   ;;  %s944_s12 = smov 8  }
  0x13   :  { %39 = dma.hbm_to_vmem [thread:$0]  %s1123_s1, 2048, %s34_s25, [#allocation6], %s943_s11, %s943_s11, %s944_s12  }
  0x14   :  { %s945_s15 = smov [#allocation2]   ;;  %s846_s19 = scalar_lea.hbm %s1122_s0, 256 }
  0x15   :  { %s21_s16 = sshll.u32 %s945_s15, 4  ;;  %p847_p8 = scmp.ne.s32.totalorder %s1122_s0, %s846_s19  ;;  %s22_s16 = int_to_ptr.vmem [resolvable:$true] %s21_s16 }
  0x16   :  { %p850_p9 = scmp.lt.u32.totalorder %s846_s19, %s1122_s0 }
  0x18   :  { %p852_p10 = pnand %p850_p9, %p847_p8 }
  0x1a   :  { %855 = shalt.err (!%p852_p10)
}
  0x1b   :  { %s856_s24 = scalar_lea.vmem %s22_s16, 256  ;;  %p861_p12 = scmp.lt.s32.totalorder %s22_s16, %s22_s16 }
  0x1c   :  { %p857_p11 = scmp.ne.s32.totalorder %s22_s16, %s856_s24  ;;  %p862_p13 = scmp.lt.s32.totalorder %s856_s24, %s856_s24 }
  0x1e   :  { %p863_p0 = por %p862_p13, %p861_p12 }
  0x20   :  { %p864_p1 = pnand %p863_p0, %p857_p11 }
  0x22   :  { %867 = shalt.err (!%p864_p1)
}
  0x23   :  { %s946_s1 = smov 64   ;;  %s947_s25 = smov 4  }
  0x24   :  { %27 = dma.hbm_to_vmem [thread:$0]  %s1122_s0, 256, %s22_s16, [#allocation3], %s946_s1, %s946_s1, %s947_s25  }
  0x25   :  { %s948_s28 = smov [#allocation7]   ;;  %s949_s30 = smov [#allocation8]  }
  0x26   :  { %s49_s29 = sshll.u32 %s948_s28, 4  ;;  %s61_s8 = sshll.u32 %s949_s30, 4  ;;  %s50_s29 = int_to_ptr.vmem [resolvable:$true] %s49_s29  ;;  %s1022_s8 = int_to_ptr.vmem [resolvable:$true] %s61_s8 }
  0x27   :  { %s868_s13 = scalar_lea.hbm %s1126_s4, 1024 }
  0x28   :  { %p869_p2 = scmp.ne.s32.totalorder %s1126_s4, %s868_s13  ;;  %p872_p3 = scmp.lt.u32.totalorder %s868_s13, %s1126_s4 }
  0x2a   :  { %p874_p4 = pnand %p872_p3, %p869_p2 }
  0x2c   :  { %877 = shalt.err (!%p874_p4)
}
  0x2d   :  { %s878_s0 = scalar_lea.vmem %s50_s29, 1024  ;;  %p883_p6 = scmp.lt.s32.totalorder %s50_s29, %s50_s29 }
  0x2e   :  { %p879_p5 = scmp.ne.s32.totalorder %s50_s29, %s878_s0  ;;  %p884_p7 = scmp.lt.s32.totalorder %s878_s0, %s878_s0 }
  0x30   :  { %p885_p8 = por %p884_p7, %p883_p6 }
  0x32   :  { %p886_p9 = pnand %p885_p8, %p879_p5 }
  0x34   :  { %889 = shalt.err (!%p886_p9)
}
  0x35   :  { %55 = dma.hbm_to_vmem [thread:$0]  %s1126_s4, 1024, %s50_s29, [#allocation6], %s946_s1, %s946_s1, %s947_s25  }
  0x36   :  { %s890_s22 = scalar_lea.hbm %s1127_s5, 1024 }
  0x37   :  { %p891_p10 = scmp.ne.s32.totalorder %s1127_s5, %s890_s22  ;;  %p894_p11 = scmp.lt.u32.totalorder %s890_s22, %s1127_s5 }
  0x39   :  { %p896_p12 = pnand %p894_p11, %p891_p10 }
  0x3b   :  { %899 = shalt.err (!%p896_p12)
}
  0x3c   :  { %s900_s28 = scalar_lea.vmem %s1022_s8, 1024  ;;  %p905_p0 = scmp.lt.s32.totalorder %s1022_s8, %s1022_s8 }
  0x3d   :  { %p901_p13 = scmp.ne.s32.totalorder %s1022_s8, %s900_s28  ;;  %p906_p1 = scmp.lt.s32.totalorder %s900_s28, %s900_s28 }
  0x3f   :  { %p907_p2 = por %p906_p1, %p905_p0 }
  0x41   :  { %p908_p3 = pnand %p907_p2, %p901_p13 }
  0x43   :  { %911 = shalt.err (!%p908_p3)
}
  0x44   :  { %67 = dma.hbm_to_vmem [thread:$0]  %s1127_s5, 1024, %s1022_s8, [#allocation9], %s946_s1, %s946_s1, %s947_s25  }
  0x45   :  { %934 = dma.done.wait [#allocation3], 256  }
  0x46   :  { %935 = vsyncadd [#allocation3], 4294967040 }
  0x47   :  { %936 = dma.done.wait [#allocation6], 3072  }
  0x48   :  { %937 = vsyncadd [#allocation6], 4294964224 }
  0x49   :  { %938 = dma.done.wait [#allocation9], 1024  }
  0x4a   :  { %939 = vsyncadd [#allocation9], 4294966272  ;;  %v950_v0 = vmov 0   ;;  %v762_v1 = vld [vmem:[#allocation5 + $0x4] ss:$8 sps:$4 sm:$0xff]   ;;  %v786_v17 = vld [vmem:[#allocation2] sm:$0xff]   ;;  %v105_v19 = vlaneseq }
  0x4b   :  { %239 = vmatprep.mubr.bf16.mxu0 %v950_v0  ;;  %v764_v2 = vld [vmem:[#allocation5] ss:$8 sps:$4 sm:$0xff]   ;;  %207 = vmatprep.subr.bf16.mxu0 %v762_v1  ;;  %v765_v3 = vld [vmem:[#allocation5 + $0x14] ss:$8 sps:$4 sm:$0xff]   ;;  %v767_v4 = vld [vmem:[#allocation5 + $0x10] ss:$8 sps:$4 sm:$0xff]  }
  0x4c   :  { %208 = vmatpush1.bf16.msra.mxu0 %v764_v2  ;;  %v768_v5 = vld [vmem:[#allocation5 + $0x24] ss:$8 sps:$4 sm:$0xff]   ;;  %v770_v6 = vld [vmem:[#allocation5 + $0x20] ss:$8 sps:$4 sm:$0xff]   ;;  %v771_v7 = vld [vmem:[#allocation5 + $0x34] ss:$8 sps:$4 sm:$0xff]  }
  0x4d   :  { %209 = vmatprep.subr.bf16.mxu0 %v765_v3  ;;  %v773_v8 = vld [vmem:[#allocation5 + $0x30] ss:$8 sps:$4 sm:$0xff]   ;;  %v774_v9 = vld [vmem:[#allocation5 + $0x44] ss:$8 sps:$4 sm:$0xff]   ;;  %v776_v10 = vld [vmem:[#allocation5 + $0x40] ss:$8 sps:$4 sm:$0xff]  }
  0x4e   :  { %v777_v11 = vld [vmem:[#allocation5 + $0x54] ss:$8 sps:$4 sm:$0xff]   ;;  %v779_v12 = vld [vmem:[#allocation5 + $0x50] ss:$8 sps:$4 sm:$0xff]   ;;  %v780_v13 = vld [vmem:[#allocation5 + $0x64] ss:$8 sps:$4 sm:$0xff]  }
  0x4f   :  { %v782_v14 = vld [vmem:[#allocation5 + $0x60] ss:$8 sps:$4 sm:$0xff]   ;;  %v783_v15 = vld [vmem:[#allocation5 + $0x74] ss:$8 sps:$4 sm:$0xff]   ;;  %v785_v16 = vld [vmem:[#allocation5 + $0x70] ss:$8 sps:$4 sm:$0xff]  }
  0x50   :  { %210 = vmatpush1.bf16.msra.mxu0 %v767_v4  ;;  %v787_v18 = vld [vmem:[#allocation2 + $0x8] sm:$0xff]   ;;  %v106_v20 = vshrl.u32 %v105_v19, 7  ;;  %v103_v22 = vld [vmem:[%s1124_s2] sm:$0x3]  ;;  %v788_v47 = vld [vmem:[#allocation8] sm:$0xff]   ;;  %s951_s8 = smov [#allocation10]  }
  0x51   :  { %211 = vmatprep.subr.bf16.mxu0 %v768_v5  ;;  %708 = vmatprep.subr.bf16.mxu1 %v788_v47  ;;  %v670_v55 = vld [vmem:[%s1125_s3] ss:$0 sm:$0xff]  ;;  %v789_v1 = vld [vmem:[#allocation8 + $0x8] sm:$0xff]   ;;  %v791_v5 = vld [vmem:[#allocation8 + $0x18] sm:$0xff]   ;;  %s638_s9 = sshll.u32 %s951_s8, 4  ;;  %s639_s9 = int_to_ptr.vmem [resolvable:$true] %s638_s9 }
  0x52   :  { %v107_v21 = vsub.s32 0, %v106_v20  ;;  %v111_v24 = vsub.s32 1, %v106_v20  ;;  %709 = vmatpush3.bf16.msra.mxu1 %v788_v47  ;;  %v790_v3 = vld [vmem:[#allocation8 + $0x10] sm:$0xff]   ;;  %s912_s10 = scalar_lea.vmem %s639_s9, 512  ;;  %p917_p5 = scmp.lt.s32.totalorder %s639_s9, %s639_s9 }
  0x53   :  { %710 = vmatprep.subr.bf16.mxu1 %v789_v1  ;;  %p913_p4 = scmp.ne.s32.totalorder %s639_s9, %s912_s10  ;;  %p918_p6 = scmp.lt.s32.totalorder %s912_s10, %s912_s10 }
  0x54   :  { %212 = vmatpush1.bf16.msra.mxu0 %v770_v6  ;;  %v108_v23 = vrot.slane %v103_v22, %v107_v21  ;;  %v112_v28 = vrot.slane %v103_v22, %v111_v24  ;;  %v792_v6 = vld [vmem:[#allocation8 + $0x20] sm:$0xff]  }
  0x55   :  { %213 = vmatprep.subr.bf16.mxu0 %v771_v7  ;;  %v793_v7 = vld [vmem:[#allocation8 + $0x28] sm:$0xff]   ;;  %p919_p7 = por %p918_p6, %p917_p5 }
  0x56   :  { %711 = vmatpush3.bf16.msra.mxu1 %v789_v1 }
  0x57   :  { %712 = vmatprep.subr.bf16.mxu1 %v790_v3  ;;  %p920_p8 = pnand %p919_p7, %p913_p4 }
  0x58   :  { %214 = vmatpush1.bf16.msra.mxu0 %v773_v8  ;;  %v794_v8 = vld [vmem:[#allocation8 + $0x30] sm:$0xff]  }
  0x59   :  { %215 = vmatprep.subr.bf16.mxu0 %v774_v9  ;;  %v795_v9 = vld [vmem:[#allocation8 + $0x38] sm:$0xff]  }
  0x5a   :  { %713 = vmatpush3.bf16.msra.mxu1 %v790_v3 }
  0x5b   :  { %714 = vmatprep.subr.bf16.mxu1 %v791_v5 }
  0x5c   :  { %216 = vmatpush1.bf16.msra.mxu0 %v776_v10  ;;  %v796_v10 = vld [vmem:[#allocation7] sm:$0xff]  }
  0x5d   :  { %217 = vmatprep.subr.bf16.mxu0 %v777_v11 }
  0x5e   :  { %715 = vmatpush3.bf16.msra.mxu1 %v791_v5 }
  0x5f   :  { %716 = vmatprep.subr.bf16.mxu1 %v792_v6 }
  0x60   :  { %218 = vmatpush1.bf16.msra.mxu0 %v779_v12 }
  0x61   :  { %219 = vmatprep.subr.bf16.mxu0 %v780_v13 }
  0x62   :  { %717 = vmatpush3.bf16.msra.mxu1 %v792_v6 }
  0x63   :  { %718 = vmatprep.subr.bf16.mxu1 %v793_v7 }
  0x64   :  { %220 = vmatpush1.bf16.msra.mxu0 %v782_v14 }
  0x65   :  { %221 = vmatprep.subr.bf16.mxu0 %v783_v15 }
  0x66   :  { %719 = vmatpush3.bf16.msra.mxu1 %v793_v7 }
  0x67   :  { %720 = vmatprep.subr.bf16.mxu1 %v794_v8 }
  0x68   :  { %222 = vmatpush1.bf16.msra.mxu0 %v785_v16 }
  0x6a   :  { %721 = vmatpush3.bf16.msra.mxu1 %v794_v8  ;;  %v801_v8 = vld [vmem:[#allocation7 + $0x28] sm:$0xff]  }
  0x6b   :  { %240 = vmatmul.mubr.bf16.vlgmr.msra.gmra.mrb[0].mxu0 %v786_v17  ;;  %722 = vmatprep.subr.bf16.mxu1 %v795_v9 }
  0x6c   :  { %249 = vmatprep.mubr.bf16.mxu0 %v950_v0 }
  0x6e   :  { %723 = vmatpush3.bf16.msra.mxu1 %v795_v9 }
  0x6f   :  { %728 = vmatprep.subr.bf16.mxu1 %v796_v10 }
  0x73   :  { %250 = vmatmul.mubr.bf16.gmra.mrb[4].mxu0 %v787_v18 }
 0x13e   :  { %v241_v25 = vpop.f32.mrb[0].mxu0 }
 0x13f   :  { %v242_v26 = vadd.f32 %v241_v25, %v108_v23  ;;  %v243_v27 = vpop.f32.mrb[1].mxu0 }
 0x140   :  { %v245_v29 = vpop.f32.mrb[2].mxu0  ;;  %v1068_v42 = vadd.f32 %v243_v27, %v112_v28 }
 0x141   :  { %v247_v30 = vpop.f32.mrb[3].mxu0  ;;  %v260_v31 = vmul.f32 %v242_v26, %v242_v26  ;;  %v246_v37 = vadd.f32 %v245_v29, %v108_v23 }
 0x142   :  { %v1062_v32 = vadd.f32 %v247_v30, %v112_v28  ;;  %v284_v45 = vmul.f32 %v1068_v42, %v1068_v42 }
 0x143   :  { %264 = vadd.xlane.f32.xlu0 %v260_v31  ;;  %v261_v43 = vmul.f32 %v246_v37, %v246_v37 }
 0x144   :  { %v285_v2 = vmul.f32 %v1062_v32, %v1062_v32 }
 0x146   :  { %v251_v33 = vpop.f32.mrb[4].mxu0 }
 0x147   :  { %v252_v34 = vadd.f32 %v251_v33, %v108_v23  ;;  %v253_v35 = vpop.f32.mrb[5].mxu0 }
 0x148   :  { %v255_v36 = vpop.f32.mrb[6].mxu0  ;;  %v1070_v44 = vadd.f32 %v253_v35, %v112_v28 }
 0x149   :  { %v1064_v38 = vadd.f32 %v255_v36, %v108_v23  ;;  %v257_v39 = vpop.f32.mrb[7].mxu0  ;;  %v262_v40 = vmul.f32 %v252_v34, %v252_v34 }
 0x14a   :  { %v1066_v41 = vadd.f32 %v257_v39, %v112_v28  ;;  %v286_v46 = vmul.f32 %v1070_v44, %v1070_v44 }
 0x14b   :  { %268 = vadd.xlane.f32.xlu0 %v262_v40  ;;  %v263_v63 = vmul.f32 %v1064_v38, %v1064_v38 }
 0x14c   :  { %v287_v4 = vmul.f32 %v1066_v41, %v1066_v41 }
 0x14f   :  { %266 = vadd.xlane.f32.xlu0 %v261_v43  ;;  %v797_v43 = vld [vmem:[#allocation7 + $0x8] sm:$0xff]  }
 0x153   :  { %288 = vadd.xlane.f32.xlu0 %v284_v45 }
 0x157   :  { %292 = vadd.xlane.f32.xlu0 %v286_v46 }
 0x1d0   :  { %v265_v48 = vpop.xlane.xlu0 %264 }
 0x1d1   :  { %v272_v49 = vmax.f32 %v265_v48, 1e-24 }
 0x1d3   :  { %804 = vrsqrt.f32 %v272_v49 }
 0x1d8   :  { %v269_v50 = vpop.xlane.xlu0 %268 }
 0x1d9   :  { %v274_v51 = vmax.f32 %v269_v50, 1e-24 }
 0x1db   :  { %806 = vrsqrt.f32 %v274_v51  ;;  %v798_v51 = vld [vmem:[#allocation7 + $0x10] sm:$0xff]  }
 0x1dc   :  { %v267_v52 = vpop.xlane.xlu0 %266 }
 0x1dd   :  { %v805_v53 = vpop.eup %804  ;;  %v273_v54 = vmax.f32 %v267_v52, 1e-24 }
 0x1de   :  { %v1079_v56 = vmul.f32 %v805_v53, %v242_v26 }
 0x1df   :  { %808 = vrsqrt.f32 %v273_v54 }
 0x1e0   :  { %v315_v57 = vmul.f32 %v670_v55, %v1079_v56 }
 0x1e2   :  { %319 = vadd.xlane.f32.xlu1 %v315_v57  ;;  %v799_v57 = vld [vmem:[#allocation7 + $0x18] sm:$0xff]  }
 0x1e5   :  { %v807_v58 = vpop.eup %806 }
 0x1e6   :  { %v1082_v59 = vmul.f32 %v807_v58, %v252_v34  ;;  %v289_v34 = vpop.xlane.xlu0 %288 }
 0x1e7   :  { %v296_v39 = vmax.f32 %v289_v34, 1e-24 }
 0x1e8   :  { %v317_v60 = vmul.f32 %v670_v55, %v1082_v59 }
 0x1e9   :  { %v809_v61 = vpop.eup %808 }
 0x1ea   :  { %323 = vadd.xlane.f32.xlu1 %v317_v60  ;;  %v1085_v62 = vmul.f32 %v809_v61, %v246_v37  ;;  %v293_v52 = vpop.xlane.xlu0 %292 }
 0x1eb   :  { %v298_v54 = vmax.f32 %v293_v52, 1e-24 }
 0x1ec   :  { %v406_v0 = vpack.c.bf16 %v1085_v62, %v1079_v56 }
 0x1ee   :  { %270 = vadd.xlane.f32.xlu1 %v263_v63  ;;  %724 = vmatprep.mubr.bf16.mxu1 %v406_v0 }
 0x1f2   :  { %290 = vadd.xlane.f32.xlu1 %v285_v2  ;;  %v800_v2 = vld [vmem:[#allocation7 + $0x20] sm:$0xff]  }
 0x1f6   :  { %294 = vadd.xlane.f32.xlu1 %v287_v4 }
 0x26f   :  { %v320_v11 = vpop.xlane.xlu1 %319 }
 0x270   :  { %v327_v12 = vmul.f32 0.25, %v320_v11 }
 0x272   :  { %v340_v13 = vmul.f32 %v327_v12, %v327_v12 }
 0x274   :  { %v345_v14 = vrot.slane %v340_v13, 4 }
 0x276   :  { %v346_v15 = vadd.f32 %v345_v14, %v340_v13 }
 0x277   :  { %v324_v16 = vpop.xlane.xlu1 %323 }
 0x278   :  { %v347_v17 = vrot.slane %v346_v15, 2  ;;  %v329_v18 = vmul.f32 0.25, %v324_v16  ;;  %v802_v16 = vld [vmem:[#allocation7 + $0x30] sm:$0xff]  }
 0x27a   :  { %v348_v19 = vadd.f32 %v347_v17, %v346_v15  ;;  %v342_v20 = vmul.f32 %v329_v18, %v329_v18 }
 0x27b   :  { %v271_v21 = vpop.xlane.xlu1 %270 }
 0x27c   :  { %v349_v22 = vrot.slane %v348_v19, 1  ;;  %v352_v23 = vrot.slane %v342_v20, 4  ;;  %v275_v24 = vmax.f32 %v271_v21, 1e-24  ;;  %v803_v21 = vld [vmem:[#allocation7 + $0x38] sm:$0xff]  }
 0x27e   :  { %v350_v25 = vadd.f32 %v349_v22, %v348_v19  ;;  %v353_v26 = vadd.f32 %v352_v23, %v342_v20  ;;  %810 = vrsqrt.f32 %v275_v24 }
 0x27f   :  { %v291_v36 = vpop.xlane.xlu1 %290 }
 0x280   :  { %v358_v27 = vmax.f32 %v350_v25, 1e-24  ;;  %v354_v28 = vrot.slane %v353_v26, 2  ;;  %v297_v46 = vmax.f32 %v291_v36, 1e-24 }
 0x282   :  { %812 = vrsqrt.f32 %v358_v27  ;;  %v355_v29 = vadd.f32 %v354_v28, %v353_v26  ;;  %v687_v27 = vld [vmem:[%s1128_s6] ss:$0 sm:$0xff] }
 0x283   :  { %v295_v53 = vpop.xlane.xlu1 %294 }
 0x284   :  { %v356_v30 = vrot.slane %v355_v29, 1  ;;  %v299_v60 = vmax.f32 %v295_v53, 1e-24 }
 0x286   :  { %v357_v31 = vadd.f32 %v356_v30, %v355_v29 }
 0x288   :  { %v811_v33 = vpop.eup %810  ;;  %v359_v35 = vmax.f32 %v357_v31, 1e-24 }
 0x289   :  { %v283_v37 = vmul.f32 %v811_v33, %v1064_v38 }
 0x28a   :  { %814 = vrsqrt.f32 %v359_v35 }
 0x28b   :  { %v407_v40 = vpack.c.bf16 %v283_v37, %v1082_v59  ;;  %816 = vrsqrt.f32 %v296_v39 }
 0x28c   :  { %v813_v45 = vpop.eup %812  ;;  %818 = vrsqrt.f32 %v297_v46 }
 0x28d   :  { %v362_v47 = vmul.f32 %v813_v45, %v327_v12  ;;  %v363_v48 = vmul.f32 0.0, %v813_v45  ;;  %725 = vmatmul.mubr.bf16.vlgmr.msra.gmra.mrb[0].mxu1 %v407_v40  ;;  %820 = vrsqrt.f32 %v298_v54 }
 0x28e   :  { %729 = vmatpush3.bf16.msra.mxu1 %v796_v10  ;;  %822 = vrsqrt.f32 %v299_v60 }
 0x28f   :  { %v366_v49 = vmul.f32 %v362_v47, %v1079_v56  ;;  %v367_v50 = vmul.f32 %v363_v48, %v1085_v62  ;;  %730 = vmatprep.subr.bf16.mxu1 %v797_v43 }
 0x291   :  { %v370_v38 = vadd.f32 %v367_v50, %v366_v49 }
 0x292   :  { %731 = vmatpush3.bf16.msra.mxu1 %v797_v43 }
 0x293   :  { %v371_v55 = vrot.slane %v370_v38, 4  ;;  %732 = vmatprep.subr.bf16.mxu1 %v798_v51 }
 0x294   :  { %v815_v58 = vpop.eup %814 }
 0x295   :  { %v372_v61 = vadd.f32 %v371_v55, %v370_v38  ;;  %v364_v63 = vmul.f32 %v815_v58, %v329_v18  ;;  %v365_v0 = vmul.f32 0.0, %v815_v58  ;;  %v817_v3 = vpop.eup %816 }
 0x296   :  { %733 = vmatpush3.bf16.msra.mxu1 %v798_v51  ;;  %v819_v6 = vpop.eup %818  ;;  %v304_v11 = vmul.f32 %v817_v3, %v1068_v42 }
 0x297   :  { %v373_v56 = vrot.slane %v372_v61, 2  ;;  %v368_v62 = vmul.f32 %v364_v63, %v1082_v59  ;;  %v369_v1 = vmul.f32 %v365_v0, %v283_v37  ;;  %734 = vmatprep.subr.bf16.mxu1 %v799_v57  ;;  %v305_v12 = vmul.f32 %v819_v6, %v1062_v32  ;;  %v821_v17 = vpop.eup %820 }
 0x298   :  { %v823_v20 = vpop.eup %822  ;;  %v306_v42 = vmul.f32 %v821_v17, %v1070_v44 }
 0x299   :  { %v377_v4 = vadd.f32 %v369_v1, %v368_v62  ;;  %v374_v5 = vadd.f32 %v373_v56, %v372_v61  ;;  %v307_v32 = vmul.f32 %v823_v20, %v1066_v41 }
 0x29a   :  { %735 = vmatpush3.bf16.msra.mxu1 %v799_v57 }
 0x29b   :  { %v378_v7 = vrot.slane %v377_v4, 4  ;;  %736 = vmatprep.subr.bf16.mxu1 %v800_v2  ;;  %v375_v9 = vrot.slane %v374_v5, 1 }
 0x29d   :  { %v379_v10 = vadd.f32 %v378_v7, %v377_v4  ;;  %v376_v13 = vadd.f32 %v375_v9, %v374_v5 }
 0x29e   :  { %737 = vmatpush3.bf16.msra.mxu1 %v800_v2 }
 0x29f   :  { %v380_v59 = vrot.slane %v379_v10, 2  ;;  %738 = vmatprep.subr.bf16.mxu1 %v801_v8  ;;  %v384_v14 = vmul.f32 %v376_v13, %v304_v11  ;;  %v385_v15 = vmul.f32 %v376_v13, %v305_v12 }
 0x2a1   :  { %v388_v18 = vpack.c.bf16 %v385_v15, %v384_v14  ;;  %v381_v19 = vadd.f32 %v380_v59, %v379_v10 }
 0x2a2   :  { %739 = vmatpush3.bf16.msra.mxu1 %v801_v8 }
 0x2a3   :  { %744 = vmatprep.mubr.bf16.mxu1 %v388_v18  ;;  %740 = vmatprep.subr.bf16.mxu1 %v802_v16  ;;  %v382_v22 = vrot.slane %v381_v19, 1 }
 0x2a5   :  { %v383_v23 = vadd.f32 %v382_v22, %v381_v19 }
 0x2a6   :  { %741 = vmatpush3.bf16.msra.mxu1 %v802_v16 }
 0x2a7   :  { %742 = vmatprep.subr.bf16.mxu1 %v803_v21  ;;  %v386_v24 = vmul.f32 %v383_v23, %v306_v42  ;;  %v387_v25 = vmul.f32 %v383_v23, %v307_v32 }
 0x2a9   :  { %v389_v26 = vpack.c.bf16 %v387_v25, %v386_v24 }
 0x2aa   :  { %743 = vmatpush3.bf16.msra.mxu1 %v803_v21 }
 0x2ad   :  { %745 = vmatmul.mubr.bf16.vlgmr.msra.gmra.mrb[0].mxu1 %v389_v26 }
 0x380   :  { %v746_v28 = vpop.f32.mrb[0].mxu1 }
 0x381   :  { %v627_v29 = vadd.f32 %v746_v28, %v687_v27  ;;  %v603_v30 = vpop.f32.mrb[1].mxu1 }
 0x382   :  { %v625_v44 = vadd.f32 %v687_v27, %v603_v30  ;;  %v747_v31 = vpop.f32.mrb[2].mxu1 }
 0x383   :  { %631 = vst [vmem:[#allocation10 + $0x10] sm:$0xff] %v627_v29  ;;  %v628_v41 = vadd.f32 %v747_v31, %v687_v27  ;;  %v606_v33 = vpop.f32.mrb[3].mxu1 }
 0x384   :  { %629 = vst [vmem:[#allocation10] sm:$0xff] %v625_v44  ;;  %v626_v34 = vadd.f32 %v687_v27, %v606_v33 }
 0x385   :  { %632 = vst [vmem:[#allocation10 + $0x18] sm:$0xff] %v628_v41 }
 0x386   :  { %630 = vst [vmem:[#allocation10 + $0x8] sm:$0xff] %v626_v34 }
 0x387   :  { %923 = shalt.err (!%p920_p8)
}
 0x388   :  { %s924_s14 = scalar_lea.hbm %s1129_s7, 512 }
 0x389   :  { %p925_p9 = scmp.ne.s32.totalorder %s1129_s7, %s924_s14  ;;  %p928_p10 = scmp.lt.u32.totalorder %s924_s14, %s1129_s7 }
 0x38b   :  { %p930_p11 = pnand %p928_p10, %p925_p9 }
 0x38d   :  { %933 = shalt.err (!%p930_p11)
}
 0x38e   :  { %644 = dma.vmem_to_hbm [thread:$0]  %s639_s9, 512, %s1129_s7, [#allocation4], %s943_s11, %s943_s11, %s944_s12  }
 0x38f   :  { %940 = dma.done.wait [#allocation4], 512  }
 0x390   :  { %941 = vsyncadd [#allocation4], 4294966784 }
 0x391   :  { %648 = vsyncpa [#allocation3], 1 }
 0x392   :  { %649 = vsyncpa [#allocation6], 1 }
 0x393   :  { %650 = vsyncpa [#allocation9], 1 }
 0x394   :  { %651 = vsyncpa [#allocation4], 1 }

</bundles_post_ra>
